<compile_context>
chip_gen: v6e
topology: v6e:2x2x1
jax: 0.10.0
libtpu: 0.0.40
codegen_flags: <defaults>
</compile_context>

<pallas_src>
import jax
import jax.numpy as jnp
import numpy as np
from jax import lax
from jax.experimental import pallas as pl
from jax.experimental.pallas import tpu as pltpu

EPS = 1e-5
LANE = 128       # TPU lane width (halo margin alignment)
CH_ALIGN = 16    # channel padding (bf16 sublane packing)


def _round_up(x, m):
    return (x + m - 1) // m * m


# ------------------------------ fused kernel -------------------------------- #
# Layouts inside the kernel (per image / grid step):
#   xph_ref : (Cin_p, nph*Lext)   phase-stacked, zero-padded, margin-extended x
#   w1_ref  : (9, Cout_p, Cin_p)  conv1 weights per tap (BN1 scale folded)
#   w2_ref  : (9, Cout_p, Cout_p) conv2 weights per tap (BN2 scale folded)
#   h1_ref  : (Cout_p, Lext)      VMEM scratch, h1 in padded layout + zero halo
#   o_ref   : (Cout_p, Pq)        block output in padded layout (border garbage
#                                 sliced off in the wrapper)
# All conv taps are constant-offset windows of the flattened padded image:
#   out[:, q] += W_tap @ slab[:, q + d_tap]

def _make_block_kernel(stride, Wq, Pq, M, Lext, has_proj):
    # conv1 taps: phase + flat offset (polyphase handles stride 2)
    taps1 = []
    for kh in range(3):
        for kw in range(3):
            ph = (kh % stride) * stride + (kw % stride)
            d = (kh // stride - 1) * Wq + (kw // stride - 1)
            taps1.append((kh * 3 + kw, ph * Lext + M + d))
    # conv2 taps: stride 1 over h1's padded layout
    taps2 = [(kh * 3 + kw, M + (kh - 1) * Wq + (kw - 1))
             for kh in range(3) for kw in range(3)]
    # shortcut read window (identity: phase-0 interior; projection: 1x1 tap)
    if has_proj:
        ph_sc = (1 % stride) * stride + (1 % stride)
        sc_start = ph_sc * Lext + M + (1 // stride - 1) * Wq + (1 // stride - 1)
    else:
        sc_start = M

    def kernel(*refs):
        if has_proj:
            (xph_ref, w1_ref, b1_ref, mask_ref, w2_ref, b2_ref,
             wsc_ref, bsc_ref, o_ref, h1_ref) = refs
        else:
            (xph_ref, w1_ref, b1_ref, mask_ref, w2_ref, b2_ref,
             o_ref, h1_ref) = refs
        cpd = h1_ref.shape[0]

        # ---- conv1 + BN1 (folded) + ReLU -> h1 (padded layout, VMEM only) ----
        acc1 = jnp.zeros((cpd, Pq), jnp.float32)
        for t, start in taps1:
            xt = xph_ref[:, start:start + Pq]
            acc1 = acc1 + jnp.dot(w1_ref[t], xt,
                                  preferred_element_type=jnp.float32)
        h1 = jnp.maximum(acc1 + b1_ref[...], 0.0) * mask_ref[...]
        h1_ref[...] = jnp.zeros_like(h1_ref)            # zero halo margins
        h1_ref[:, M:M + Pq] = h1.astype(h1_ref.dtype)

        # ---- conv2 + BN2 (folded) + shortcut + ReLU ----
        acc2 = jnp.zeros((cpd, Pq), jnp.float32)
        for t, start in taps2:
            acc2 = acc2 + jnp.dot(w2_ref[t], h1_ref[:, start:start + Pq],
                                  preferred_element_type=jnp.float32)
        y = acc2 + b2_ref[...]
        if has_proj:
            xs = xph_ref[:, sc_start:sc_start + Pq]
            y = y + jnp.dot(wsc_ref[...], xs,
                            preferred_element_type=jnp.float32) + bsc_ref[...]
        else:
            y = y + xph_ref[:, sc_start:sc_start + Pq].astype(jnp.float32)
        o_ref[...] = jnp.maximum(y, 0.0)

    return kernel


# ------------------------------ JAX glue code -------------------------------- #

def _fold_bn(conv_bias, gamma, beta, mean, var):
    scale = gamma / jnp.sqrt(var + EPS)
    bias = (conv_bias - mean) * scale + beta
    return scale, bias


def _tap_weights(w, scale, cout_p, cin_p, dtype):
    # (Cout, Cin, 3, 3) -> (9, Cout_p, Cin_p), tap-major, BN scale folded.
    co, ci, _, _ = w.shape
    w = w * scale[:, None, None, None]
    w = jnp.transpose(w, (2, 3, 0, 1)).reshape(9, co, ci)
    return jnp.pad(w, ((0, 0), (0, cout_p - co), (0, cin_p - ci))).astype(dtype)


def residual_block_forward(x_nchw, params, inCh, outCh, stride,
                           compute_dtype=jnp.bfloat16):
    x = x_nchw.astype(jnp.float32)
    N, _, H, W = x.shape
    out_h = (H + 2 - 3) // stride + 1
    out_w = (W + 2 - 3) // stride + 1
    Hq, Wq = out_h + 2, out_w + 2          # padded-layout dims
    Pq = Hq * Wq                           # padded-layout flat length
    M = _round_up(Wq + 1, LANE)            # halo margin (covers all tap shifts)
    Lext = Pq + 2 * M
    nph = stride * stride
    cin_p = _round_up(inCh, CH_ALIGN)
    cout_p = _round_up(outCh, CH_ALIGN)
    has_proj = (stride != 1 or inCh != outCh)

    # ---- planar, zero-padded, polyphase, margin-extended input (1x traffic) ----
    x_pad = jnp.pad(x, ((0, 0), (0, 0), (1, 1), (1, 1)))
    phases = []
    for a in range(stride):
        for b in range(stride):
            ph = x_pad[:, :, a::stride, b::stride][:, :, :Hq, :Wq]
            ph = jnp.pad(ph, ((0, 0), (0, 0),
                              (0, Hq - ph.shape[2]), (0, Wq - ph.shape[3])))
            phases.append(ph.reshape(N, inCh, Pq))
    xph = jnp.stack(phases, axis=1)                            # (N,nph,Cin,Pq)
    xph = jnp.pad(xph, ((0, 0), (0, 0), (0, cin_p - inCh), (M, M)))
    xph = jnp.transpose(xph, (0, 2, 1, 3)).reshape(N, cin_p, nph * Lext)
    xph = xph.astype(compute_dtype)

    # ---- BN-folded weights / biases ----
    s1, b1 = _fold_bn(params["b1"], *params["bn1"])
    w1 = _tap_weights(params["w1"], s1, cout_p, cin_p, compute_dtype)
    b1 = jnp.pad(b1, (0, cout_p - outCh))[:, None]
    s2, b2 = _fold_bn(params["b2"], *params["bn2"])
    w2 = _tap_weights(params["w2"], s2, cout_p, cout_p, compute_dtype)
    b2 = jnp.pad(b2, (0, cout_p - outCh))[:, None]

    # interior mask (zeroes h1's halo so conv2 sees true zero padding)
    mask = jnp.zeros((Hq, Wq), jnp.float32)
    mask = mask.at[1:1 + out_h, 1:1 + out_w].set(1.0).reshape(1, Pq)

    inputs = [xph, w1, b1, mask, w2, b2]
    in_specs = [
        pl.BlockSpec((None, cin_p, nph * Lext), lambda n: (n, 0, 0)),
        pl.BlockSpec((9, cout_p, cin_p), lambda n: (0, 0, 0)),
        pl.BlockSpec((cout_p, 1), lambda n: (0, 0)),
        pl.BlockSpec((1, Pq), lambda n: (0, 0)),
        pl.BlockSpec((9, cout_p, cout_p), lambda n: (0, 0, 0)),
        pl.BlockSpec((cout_p, 1), lambda n: (0, 0)),
    ]
    flops = 2 * N * cout_p * Pq * 9 * (cin_p + cout_p)
    if has_proj:
        ssc, bsc = _fold_bn(params["bsc"], *params["bnsc"])
        wsc = params["wsc"][:, :, 0, 0] * ssc[:, None]
        wsc = jnp.pad(wsc, ((0, cout_p - outCh),
                            (0, cin_p - inCh))).astype(compute_dtype)
        bsc = jnp.pad(bsc, (0, cout_p - outCh))[:, None]
        inputs += [wsc, bsc]
        in_specs += [pl.BlockSpec((cout_p, cin_p), lambda n: (0, 0)),
                     pl.BlockSpec((cout_p, 1), lambda n: (0, 0))]
        flops += 2 * N * cout_p * Pq * cin_p

    kernel = _make_block_kernel(stride, Wq, Pq, M, Lext, has_proj)

    # explicit VMEM budget (double-buffered streamed blocks + scratch + slack)
    it = np.dtype(compute_dtype).itemsize
    block_bytes = (cin_p * nph * Lext * it                 # xph block
                   + 9 * cout_p * (cin_p + cout_p) * it    # w1, w2
                   + (cout_p * cin_p * it if has_proj else 0)
                   + 3 * cout_p * 4 + Pq * 4               # biases + mask
                   + cout_p * Pq * 4                       # output block
                   + cout_p * Lext * it)                   # h1 scratch
    vmem_limit = max(16 << 20, min(3 * int(block_bytes) + (4 << 20), 64 << 20))

    bytes_accessed = int(sum(int(a.size) * a.dtype.itemsize for a in inputs)
                         + N * cout_p * Pq * 4)

    out = pl.pallas_call(
        kernel,
        out_shape=jax.ShapeDtypeStruct((N, cout_p, Pq), jnp.float32),
        grid=(N,),
        in_specs=in_specs,
        out_specs=pl.BlockSpec((None, cout_p, Pq), lambda n: (n, 0, 0)),
        scratch_shapes=[pltpu.VMEM((cout_p, Lext), compute_dtype)],
        compiler_params=pltpu.CompilerParams(
            dimension_semantics=("parallel",),
            vmem_limit_bytes=vmem_limit),
        cost_estimate=pl.CostEstimate(flops=int(flops), transcendentals=0,
                                      bytes_accessed=bytes_accessed),
    )(*inputs)

    out = out.reshape(N, cout_p, Hq, Wq)[:, :outCh, 1:1 + out_h, 1:1 + out_w]
    return out


# ------------------------------- parameters ---------------------------------- #

def init_residual_block_params(key, inCh, outCh, stride):
    ks = jax.random.split(key, 18)

    def conv_w(k, co, ci, kh, kw):
        bound = 1.0 / np.sqrt(ci * kh * kw)
        return jax.random.uniform(k, (co, ci, kh, kw), jnp.float32, -bound, bound)

    def conv_b(k, co, fan_in):
        bound = 1.0 / np.sqrt(fan_in)
        return jax.random.uniform(k, (co,), jnp.float32, -bound, bound)

    def bn_params(k0, k1, k2, k3, c):
        return (1.0 + 0.1 * jax.random.normal(k0, (c,), jnp.float32),
                0.1 * jax.random.normal(k1, (c,), jnp.float32),
                0.1 * jax.random.normal(k2, (c,), jnp.float32),
                jnp.abs(1.0 + 0.1 * jax.random.normal(k3, (c,), jnp.float32)))

    params = {
        "w1": conv_w(ks[0], outCh, inCh, 3, 3),
        "b1": conv_b(ks[1], outCh, inCh * 9),
        "bn1": bn_params(ks[2], ks[3], ks[4], ks[5], outCh),
        "w2": conv_w(ks[6], outCh, outCh, 3, 3),
        "b2": conv_b(ks[7], outCh, outCh * 9),
        "bn2": bn_params(ks[8], ks[9], ks[10], ks[11], outCh),
    }
    if stride != 1 or inCh != outCh:
        params["wsc"] = conv_w(ks[12], outCh, inCh, 1, 1)
        params["bsc"] = conv_b(ks[13], outCh, inCh)
        params["bnsc"] = bn_params(ks[14], ks[15], ks[16], ks[17], outCh)
    return params


# ----------------------------- pure-JAX reference ---------------------------- #

def _ref_forward(x_nchw, params, inCh, outCh, stride):
    def conv(x, w, b, s, pad):
        y = lax.conv_general_dilated(
            x, w, (s, s), [(pad, pad), (pad, pad)],
            dimension_numbers=("NCHW", "OIHW", "NCHW"))
        return y + b[None, :, None, None]

    def bn(x, p):
        g, be, m, v = p
        return ((x - m[None, :, None, None]) /
                jnp.sqrt(v[None, :, None, None] + EPS)) * g[None, :, None, None] \
               + be[None, :, None, None]

    h = jnp.maximum(bn(conv(x_nchw, params["w1"], params["b1"], stride, 1),
                       params["bn1"]), 0.0)
    h = bn(conv(h, params["w2"], params["b2"], 1, 1), params["bn2"])
    if "wsc" in params:
        sc = bn(conv(x_nchw, params["wsc"], params["bsc"], stride, 0),
                params["bnsc"])
    else:
        sc = x_nchw
    return jnp.maximum(h + sc, 0.0)


# ----------------------------------- main ------------------------------------ #

def _check(x, params, inCh, outCh, stride, expected_shape):
    ref = _ref_forward(x, params, inCh, outCh, stride)
    # f32 operand path: tight tolerance
    y32 = residual_block_forward(x, params, inCh, outCh, stride,
                                 compute_dtype=jnp.float32)
    jax.block_until_ready(y32)
    assert y32.shape == expected_shape
    np.testing.assert_allclose(np.asarray(y32), np.asarray(ref),
                               rtol=2e-3, atol=2e-3)
    # bf16 operand path (default): f32 MXU accumulation, relaxed tolerance
    ybf = residual_block_forward(x, params, inCh, outCh, stride)
    jax.block_until_ready(ybf)
    assert ybf.shape == expected_shape
    np.testing.assert_allclose(np.asarray(ybf), np.asarray(ref),
                               rtol=6e-2, atol=6e-2)


if __name__ == "__main__":
    key = jax.random.PRNGKey(0)
    kx1, kx2, kx3, kp1, kp2, kp3 = jax.random.split(key, 6)

    # Case 1: projection shortcut (stride=2, 4 -> 8 channels)
    x1 = jax.random.normal(kx1, (2, 4, 16, 16), jnp.float32)
    params1 = init_residual_block_params(kp1, 4, 8, 2)
    _check(x1, params1, 4, 8, 2, (2, 8, 8, 8))

    # Case 2: identity shortcut (stride=1, 8 -> 8 channels)
    x2 = jax.random.normal(kx2, (2, 8, 16, 16), jnp.float32)
    params2 = init_residual_block_params(kp2, 8, 8, 1)
    _check(x2, params2, 8, 8, 1, (2, 8, 16, 16))

    # Case 3: identity shortcut at 32x32 (larger spatial slab)
    x3 = jax.random.normal(kx3, (2, 8, 32, 32), jnp.float32)
    params3 = init_residual_block_params(kp3, 8, 8, 1)
    _check(x3, params3, 8, 8, 1, (2, 8, 32, 32))

    print("KERNEL_OK")
</pallas_src>

<mosaic_0001>
module attributes {stable_mosaic.version = 11 : i64} {
  func.func @kernel(%arg0: i32, %arg1: memref<1x16x1424xf32, #tpu.memory_space<vmem>>, %arg2: memref<9x16x16xf32, #tpu.memory_space<vmem>>, %arg3: memref<16x1xf32, #tpu.memory_space<vmem>>, %arg4: memref<1x100xf32, #tpu.memory_space<vmem>>, %arg5: memref<9x16x16xf32, #tpu.memory_space<vmem>>, %arg6: memref<16x1xf32, #tpu.memory_space<vmem>>, %arg7: memref<16x16xf32, #tpu.memory_space<vmem>>, %arg8: memref<16x1xf32, #tpu.memory_space<vmem>>, %arg9: memref<1x16x100xf32, #tpu.memory_space<vmem>>, %arg10: memref<16x356xf32, #tpu.memory_space<vmem>>) attributes {dimension_semantics = [#tpu.dimension_semantics<parallel>], iteration_bounds = array<i64: 2>, scalar_prefetch = 0 : i64, scratch_operands = 1 : i64, tpu.core_type = #tpu.core_type<tc>, window_params = [{transform_indices = @transform_0, window_bounds = array<i64: 1, 16, 1424>}, {pipeline_mode = #tpu.pipeline_mode<synchronous>, transform_indices = @transform_1, window_bounds = array<i64: 9, 16, 16>}, {pipeline_mode = #tpu.pipeline_mode<synchronous>, transform_indices = @transform_2, window_bounds = array<i64: 16, 1>}, {pipeline_mode = #tpu.pipeline_mode<synchronous>, transform_indices = @transform_3, window_bounds = array<i64: 1, 100>}, {pipeline_mode = #tpu.pipeline_mode<synchronous>, transform_indices = @transform_4, window_bounds = array<i64: 9, 16, 16>}, {pipeline_mode = #tpu.pipeline_mode<synchronous>, transform_indices = @transform_5, window_bounds = array<i64: 16, 1>}, {pipeline_mode = #tpu.pipeline_mode<synchronous>, transform_indices = @transform_6, window_bounds = array<i64: 16, 16>}, {pipeline_mode = #tpu.pipeline_mode<synchronous>, transform_indices = @transform_7, window_bounds = array<i64: 16, 1>}, {transform_indices = @transform_8, window_bounds = array<i64: 1, 16, 100>}]} {
    %cst = arith.constant 0.000000e+00 : f32
    %0 = vector.broadcast %cst : f32 to vector<16x100xf32>
    %c0 = arith.constant 0 : index
    %c0_0 = arith.constant 0 : index
    %c117 = arith.constant 117 : index
    %1 = vector.load %arg1[%c0, %c0_0, %c117] : memref<1x16x1424xf32, #tpu.memory_space<vmem>>, vector<1x16x100xf32>
    %2 = vector.shape_cast %1 : vector<1x16x100xf32> to vector<16x100xf32>
    %c0_1 = arith.constant 0 : index
    %c0_2 = arith.constant 0 : index
    %c0_3 = arith.constant 0 : index
    %3 = vector.load %arg2[%c0_1, %c0_2, %c0_3] : memref<9x16x16xf32, #tpu.memory_space<vmem>>, vector<1x16x16xf32>
    %4 = vector.shape_cast %3 : vector<1x16x16xf32> to vector<16x16xf32>
    %cst_4 = arith.constant dense<0.000000e+00> : vector<16x100xf32>
    %5 = tpu.matmul %4, %2, %cst_4 {dimension_numbers = #tpu.dot_dimension_numbers<[1], [0], [0], [1], [0, 0, 1, 1], [], []>} : vector<16x16xf32>, vector<16x100xf32>, vector<16x100xf32> -> vector<16x100xf32>
    %6 = arith.addf %0, %5 : vector<16x100xf32>
    %c0_5 = arith.constant 0 : index
    %c0_6 = arith.constant 0 : index
    %c473 = arith.constant 473 : index
    %7 = vector.load %arg1[%c0_5, %c0_6, %c473] : memref<1x16x1424xf32, #tpu.memory_space<vmem>>, vector<1x16x100xf32>
    %8 = vector.shape_cast %7 : vector<1x16x100xf32> to vector<16x100xf32>
    %c1 = arith.constant 1 : index
    %c0_7 = arith.constant 0 : index
    %c0_8 = arith.constant 0 : index
    %9 = vector.load %arg2[%c1, %c0_7, %c0_8] : memref<9x16x16xf32, #tpu.memory_space<vmem>>, vector<1x16x16xf32>
    %10 = vector.shape_cast %9 : vector<1x16x16xf32> to vector<16x16xf32>
    %cst_9 = arith.constant dense<0.000000e+00> : vector<16x100xf32>
    %11 = tpu.matmul %10, %8, %cst_9 {dimension_numbers = #tpu.dot_dimension_numbers<[1], [0], [0], [1], [0, 0, 1, 1], [], []>} : vector<16x16xf32>, vector<16x100xf32>, vector<16x100xf32> -> vector<16x100xf32>
    %12 = arith.addf %6, %11 : vector<16x100xf32>
    %c0_10 = arith.constant 0 : index
    %c0_11 = arith.constant 0 : index
    %c118 = arith.constant 118 : index
    %13 = vector.load %arg1[%c0_10, %c0_11, %c118] : memref<1x16x1424xf32, #tpu.memory_space<vmem>>, vector<1x16x100xf32>
    %14 = vector.shape_cast %13 : vector<1x16x100xf32> to vector<16x100xf32>
    %c2 = arith.constant 2 : index
    %c0_12 = arith.constant 0 : index
    %c0_13 = arith.constant 0 : index
    %15 = vector.load %arg2[%c2, %c0_12, %c0_13] : memref<9x16x16xf32, #tpu.memory_space<vmem>>, vector<1x16x16xf32>
    %16 = vector.shape_cast %15 : vector<1x16x16xf32> to vector<16x16xf32>
    %cst_14 = arith.constant dense<0.000000e+00> : vector<16x100xf32>
    %17 = tpu.matmul %16, %14, %cst_14 {dimension_numbers = #tpu.dot_dimension_numbers<[1], [0], [0], [1], [0, 0, 1, 1], [], []>} : vector<16x16xf32>, vector<16x100xf32>, vector<16x100xf32> -> vector<16x100xf32>
    %18 = arith.addf %12, %17 : vector<16x100xf32>
    %c0_15 = arith.constant 0 : index
    %c0_16 = arith.constant 0 : index
    %c829 = arith.constant 829 : index
    %19 = vector.load %arg1[%c0_15, %c0_16, %c829] : memref<1x16x1424xf32, #tpu.memory_space<vmem>>, vector<1x16x100xf32>
    %20 = vector.shape_cast %19 : vector<1x16x100xf32> to vector<16x100xf32>
    %c3 = arith.constant 3 : index
    %c0_17 = arith.constant 0 : index
    %c0_18 = arith.constant 0 : index
    %21 = vector.load %arg2[%c3, %c0_17, %c0_18] : memref<9x16x16xf32, #tpu.memory_space<vmem>>, vector<1x16x16xf32>
    %22 = vector.shape_cast %21 : vector<1x16x16xf32> to vector<16x16xf32>
    %cst_19 = arith.constant dense<0.000000e+00> : vector<16x100xf32>
    %23 = tpu.matmul %22, %20, %cst_19 {dimension_numbers = #tpu.dot_dimension_numbers<[1], [0], [0], [1], [0, 0, 1, 1], [], []>} : vector<16x16xf32>, vector<16x100xf32>, vector<16x100xf32> -> vector<16x100xf32>
    %24 = arith.addf %18, %23 : vector<16x100xf32>
    %c0_20 = arith.constant 0 : index
    %c0_21 = arith.constant 0 : index
    %c1185 = arith.constant 1185 : index
    %25 = vector.load %arg1[%c0_20, %c0_21, %c1185] : memref<1x16x1424xf32, #tpu.memory_space<vmem>>, vector<1x16x100xf32>
    %26 = vector.shape_cast %25 : vector<1x16x100xf32> to vector<16x100xf32>
    %c4 = arith.constant 4 : index
    %c0_22 = arith.constant 0 : index
    %c0_23 = arith.constant 0 : index
    %27 = vector.load %arg2[%c4, %c0_22, %c0_23] : memref<9x16x16xf32, #tpu.memory_space<vmem>>, vector<1x16x16xf32>
    %28 = vector.shape_cast %27 : vector<1x16x16xf32> to vector<16x16xf32>
    %cst_24 = arith.constant dense<0.000000e+00> : vector<16x100xf32>
    %29 = tpu.matmul %28, %26, %cst_24 {dimension_numbers = #tpu.dot_dimension_numbers<[1], [0], [0], [1], [0, 0, 1, 1], [], []>} : vector<16x16xf32>, vector<16x100xf32>, vector<16x100xf32> -> vector<16x100xf32>
    %30 = arith.addf %24, %29 : vector<16x100xf32>
    %c0_25 = arith.constant 0 : index
    %c0_26 = arith.constant 0 : index
    %c830 = arith.constant 830 : index
    %31 = vector.load %arg1[%c0_25, %c0_26, %c830] : memref<1x16x1424xf32, #tpu.memory_space<vmem>>, vector<1x16x100xf32>
    %32 = vector.shape_cast %31 : vector<1x16x100xf32> to vector<16x100xf32>
    %c5 = arith.constant 5 : index
    %c0_27 = arith.constant 0 : index
    %c0_28 = arith.constant 0 : index
    %33 = vector.load %arg2[%c5, %c0_27, %c0_28] : memref<9x16x16xf32, #tpu.memory_space<vmem>>, vector<1x16x16xf32>
    %34 = vector.shape_cast %33 : vector<1x16x16xf32> to vector<16x16xf32>
    %cst_29 = arith.constant dense<0.000000e+00> : vector<16x100xf32>
    %35 = tpu.matmul %34, %32, %cst_29 {dimension_numbers = #tpu.dot_dimension_numbers<[1], [0], [0], [1], [0, 0, 1, 1], [], []>} : vector<16x16xf32>, vector<16x100xf32>, vector<16x100xf32> -> vector<16x100xf32>
    %36 = arith.addf %30, %35 : vector<16x100xf32>
    %c0_30 = arith.constant 0 : index
    %c0_31 = arith.constant 0 : index
    %c127 = arith.constant 127 : index
    %37 = vector.load %arg1[%c0_30, %c0_31, %c127] : memref<1x16x1424xf32, #tpu.memory_space<vmem>>, vector<1x16x100xf32>
    %38 = vector.shape_cast %37 : vector<1x16x100xf32> to vector<16x100xf32>
    %c6 = arith.constant 6 : index
    %c0_32 = arith.constant 0 : index
    %c0_33 = arith.constant 0 : index
    %39 = vector.load %arg2[%c6, %c0_32, %c0_33] : memref<9x16x16xf32, #tpu.memory_space<vmem>>, vector<1x16x16xf32>
    %40 = vector.shape_cast %39 : vector<1x16x16xf32> to vector<16x16xf32>
    %cst_34 = arith.constant dense<0.000000e+00> : vector<16x100xf32>
    %41 = tpu.matmul %40, %38, %cst_34 {dimension_numbers = #tpu.dot_dimension_numbers<[1], [0], [0], [1], [0, 0, 1, 1], [], []>} : vector<16x16xf32>, vector<16x100xf32>, vector<16x100xf32> -> vector<16x100xf32>
    %42 = arith.addf %36, %41 : vector<16x100xf32>
    %c0_35 = arith.constant 0 : index
    %c0_36 = arith.constant 0 : index
    %c483 = arith.constant 483 : index
    %43 = vector.load %arg1[%c0_35, %c0_36, %c483] : memref<1x16x1424xf32, #tpu.memory_space<vmem>>, vector<1x16x100xf32>
    %44 = vector.shape_cast %43 : vector<1x16x100xf32> to vector<16x100xf32>
    %c7 = arith.constant 7 : index
    %c0_37 = arith.constant 0 : index
    %c0_38 = arith.constant 0 : index
    %45 = vector.load %arg2[%c7, %c0_37, %c0_38] : memref<9x16x16xf32, #tpu.memory_space<vmem>>, vector<1x16x16xf32>
    %46 = vector.shape_cast %45 : vector<1x16x16xf32> to vector<16x16xf32>
    %cst_39 = arith.constant dense<0.000000e+00> : vector<16x100xf32>
    %47 = tpu.matmul %46, %44, %cst_39 {dimension_numbers = #tpu.dot_dimension_numbers<[1], [0], [0], [1], [0, 0, 1, 1], [], []>} : vector<16x16xf32>, vector<16x100xf32>, vector<16x100xf32> -> vector<16x100xf32>
    %48 = arith.addf %42, %47 : vector<16x100xf32>
    %c0_40 = arith.constant 0 : index
    %c0_41 = arith.constant 0 : index
    %c128 = arith.constant 128 : index
    %49 = vector.load %arg1[%c0_40, %c0_41, %c128] : memref<1x16x1424xf32, #tpu.memory_space<vmem>>, vector<1x16x100xf32>
    %50 = vector.shape_cast %49 : vector<1x16x100xf32> to vector<16x100xf32>
    %c8 = arith.constant 8 : index
    %c0_42 = arith.constant 0 : index
    %c0_43 = arith.constant 0 : index
    %51 = vector.load %arg2[%c8, %c0_42, %c0_43] : memref<9x16x16xf32, #tpu.memory_space<vmem>>, vector<1x16x16xf32>
    %52 = vector.shape_cast %51 : vector<1x16x16xf32> to vector<16x16xf32>
    %cst_44 = arith.constant dense<0.000000e+00> : vector<16x100xf32>
    %53 = tpu.matmul %52, %50, %cst_44 {dimension_numbers = #tpu.dot_dimension_numbers<[1], [0], [0], [1], [0, 0, 1, 1], [], []>} : vector<16x16xf32>, vector<16x100xf32>, vector<16x100xf32> -> vector<16x100xf32>
    %54 = arith.addf %48, %53 : vector<16x100xf32>
    %c0_45 = arith.constant 0 : index
    %c0_46 = arith.constant 0 : index
    %55 = vector.load %arg3[%c0_45, %c0_46] : memref<16x1xf32, #tpu.memory_space<vmem>>, vector<16x1xf32>
    %56 = vector.broadcast %55 : vector<16x1xf32> to vector<16x100xf32>
    %57 = arith.addf %54, %56 : vector<16x100xf32>
    %cst_47 = arith.constant 0.000000e+00 : f32
    %58 = vector.broadcast %cst_47 : f32 to vector<16x100xf32>
    %59 = arith.maximumf %57, %58 : vector<16x100xf32>
    %c0_48 = arith.constant 0 : index
    %c0_49 = arith.constant 0 : index
    %60 = vector.load %arg4[%c0_48, %c0_49] : memref<1x100xf32, #tpu.memory_space<vmem>>, vector<1x100xf32>
    %61 = vector.broadcast %60 : vector<1x100xf32> to vector<16x100xf32>
    %62 = arith.mulf %59, %61 : vector<16x100xf32>
    %cst_50 = arith.constant 0.000000e+00 : f32
    %63 = vector.broadcast %cst_50 : f32 to vector<16x356xf32>
    %c0_51 = arith.constant 0 : index
    %c0_52 = arith.constant 0 : index
    %64 = vector.load %arg10[%c0_51, %c0_52] : memref<16x356xf32, #tpu.memory_space<vmem>>, vector<16x356xf32>
    tpu.vector_store %arg10[%c0_51, %c0_52], %63 {strides = array<i32>} : memref<16x356xf32, #tpu.memory_space<vmem>>, vector<16x356xf32>,
    %c0_53 = arith.constant 0 : index
    %c128_54 = arith.constant 128 : index
    %65 = vector.load %arg10[%c0_53, %c128_54] : memref<16x356xf32, #tpu.memory_space<vmem>>, vector<16x100xf32>
    tpu.vector_store %arg10[%c0_53, %c128_54], %62 {strides = array<i32>} : memref<16x356xf32, #tpu.memory_space<vmem>>, vector<16x100xf32>,
    %cst_55 = arith.constant 0.000000e+00 : f32
    %66 = vector.broadcast %cst_55 : f32 to vector<16x100xf32>
    %c0_56 = arith.constant 0 : index
    %c0_57 = arith.constant 0 : index
    %c0_58 = arith.constant 0 : index
    %67 = vector.load %arg5[%c0_56, %c0_57, %c0_58] : memref<9x16x16xf32, #tpu.memory_space<vmem>>, vector<1x16x16xf32>
    %68 = vector.shape_cast %67 : vector<1x16x16xf32> to vector<16x16xf32>
    %c0_59 = arith.constant 0 : index
    %c117_60 = arith.constant 117 : index
    %69 = vector.load %arg10[%c0_59, %c117_60] : memref<16x356xf32, #tpu.memory_space<vmem>>, vector<16x100xf32>
    %cst_61 = arith.constant dense<0.000000e+00> : vector<16x100xf32>
    %70 = tpu.matmul %68, %69, %cst_61 {dimension_numbers = #tpu.dot_dimension_numbers<[1], [0], [0], [1], [0, 0, 1, 1], [], []>} : vector<16x16xf32>, vector<16x100xf32>, vector<16x100xf32> -> vector<16x100xf32>
    %71 = arith.addf %66, %70 : vector<16x100xf32>
    %c1_62 = arith.constant 1 : index
    %c0_63 = arith.constant 0 : index
    %c0_64 = arith.constant 0 : index
    %72 = vector.load %arg5[%c1_62, %c0_63, %c0_64] : memref<9x16x16xf32, #tpu.memory_space<vmem>>, vector<1x16x16xf32>
    %73 = vector.shape_cast %72 : vector<1x16x16xf32> to vector<16x16xf32>
    %c0_65 = arith.constant 0 : index
    %c118_66 = arith.constant 118 : index
    %74 = vector.load %arg10[%c0_65, %c118_66] : memref<16x356xf32, #tpu.memory_space<vmem>>, vector<16x100xf32>
    %cst_67 = arith.constant dense<0.000000e+00> : vector<16x100xf32>
    %75 = tpu.matmul %73, %74, %cst_67 {dimension_numbers = #tpu.dot_dimension_numbers<[1], [0], [0], [1], [0, 0, 1, 1], [], []>} : vector<16x16xf32>, vector<16x100xf32>, vector<16x100xf32> -> vector<16x100xf32>
    %76 = arith.addf %71, %75 : vector<16x100xf32>
    %c2_68 = arith.constant 2 : index
    %c0_69 = arith.constant 0 : index
    %c0_70 = arith.constant 0 : index
    %77 = vector.load %arg5[%c2_68, %c0_69, %c0_70] : memref<9x16x16xf32, #tpu.memory_space<vmem>>, vector<1x16x16xf32>
    %78 = vector.shape_cast %77 : vector<1x16x16xf32> to vector<16x16xf32>
    %c0_71 = arith.constant 0 : index
    %c119 = arith.constant 119 : index
    %79 = vector.load %arg10[%c0_71, %c119] : memref<16x356xf32, #tpu.memory_space<vmem>>, vector<16x100xf32>
    %cst_72 = arith.constant dense<0.000000e+00> : vector<16x100xf32>
    %80 = tpu.matmul %78, %79, %cst_72 {dimension_numbers = #tpu.dot_dimension_numbers<[1], [0], [0], [1], [0, 0, 1, 1], [], []>} : vector<16x16xf32>, vector<16x100xf32>, vector<16x100xf32> -> vector<16x100xf32>
    %81 = arith.addf %76, %80 : vector<16x100xf32>
    %c3_73 = arith.constant 3 : index
    %c0_74 = arith.constant 0 : index
    %c0_75 = arith.constant 0 : index
    %82 = vector.load %arg5[%c3_73, %c0_74, %c0_75] : memref<9x16x16xf32, #tpu.memory_space<vmem>>, vector<1x16x16xf32>
    %83 = vector.shape_cast %82 : vector<1x16x16xf32> to vector<16x16xf32>
    %c0_76 = arith.constant 0 : index
    %c127_77 = arith.constant 127 : index
    %84 = vector.load %arg10[%c0_76, %c127_77] : memref<16x356xf32, #tpu.memory_space<vmem>>, vector<16x100xf32>
    %cst_78 = arith.constant dense<0.000000e+00> : vector<16x100xf32>
    %85 = tpu.matmul %83, %84, %cst_78 {dimension_numbers = #tpu.dot_dimension_numbers<[1], [0], [0], [1], [0, 0, 1, 1], [], []>} : vector<16x16xf32>, vector<16x100xf32>, vector<16x100xf32> -> vector<16x100xf32>
    %86 = arith.addf %81, %85 : vector<16x100xf32>
    %c4_79 = arith.constant 4 : index
    %c0_80 = arith.constant 0 : index
    %c0_81 = arith.constant 0 : index
    %87 = vector.load %arg5[%c4_79, %c0_80, %c0_81] : memref<9x16x16xf32, #tpu.memory_space<vmem>>, vector<1x16x16xf32>
    %88 = vector.shape_cast %87 : vector<1x16x16xf32> to vector<16x16xf32>
    %c0_82 = arith.constant 0 : index
    %c128_83 = arith.constant 128 : index
    %89 = vector.load %arg10[%c0_82, %c128_83] : memref<16x356xf32, #tpu.memory_space<vmem>>, vector<16x100xf32>
    %cst_84 = arith.constant dense<0.000000e+00> : vector<16x100xf32>
    %90 = tpu.matmul %88, %89, %cst_84 {dimension_numbers = #tpu.dot_dimension_numbers<[1], [0], [0], [1], [0, 0, 1, 1], [], []>} : vector<16x16xf32>, vector<16x100xf32>, vector<16x100xf32> -> vector<16x100xf32>
    %91 = arith.addf %86, %90 : vector<16x100xf32>
    %c5_85 = arith.constant 5 : index
    %c0_86 = arith.constant 0 : index
    %c0_87 = arith.constant 0 : index
    %92 = vector.load %arg5[%c5_85, %c0_86, %c0_87] : memref<9x16x16xf32, #tpu.memory_space<vmem>>, vector<1x16x16xf32>
    %93 = vector.shape_cast %92 : vector<1x16x16xf32> to vector<16x16xf32>
    %c0_88 = arith.constant 0 : index
    %c129 = arith.constant 129 : index
    %94 = vector.load %arg10[%c0_88, %c129] : memref<16x356xf32, #tpu.memory_space<vmem>>, vector<16x100xf32>
    %cst_89 = arith.constant dense<0.000000e+00> : vector<16x100xf32>
    %95 = tpu.matmul %93, %94, %cst_89 {dimension_numbers = #tpu.dot_dimension_numbers<[1], [0], [0], [1], [0, 0, 1, 1], [], []>} : vector<16x16xf32>, vector<16x100xf32>, vector<16x100xf32> -> vector<16x100xf32>
    %96 = arith.addf %91, %95 : vector<16x100xf32>
    %c6_90 = arith.constant 6 : index
    %c0_91 = arith.constant 0 : index
    %c0_92 = arith.constant 0 : index
    %97 = vector.load %arg5[%c6_90, %c0_91, %c0_92] : memref<9x16x16xf32, #tpu.memory_space<vmem>>, vector<1x16x16xf32>
    %98 = vector.shape_cast %97 : vector<1x16x16xf32> to vector<16x16xf32>
    %c0_93 = arith.constant 0 : index
    %c137 = arith.constant 137 : index
    %99 = vector.load %arg10[%c0_93, %c137] : memref<16x356xf32, #tpu.memory_space<vmem>>, vector<16x100xf32>
    %cst_94 = arith.constant dense<0.000000e+00> : vector<16x100xf32>
    %100 = tpu.matmul %98, %99, %cst_94 {dimension_numbers = #tpu.dot_dimension_numbers<[1], [0], [0], [1], [0, 0, 1, 1], [], []>} : vector<16x16xf32>, vector<16x100xf32>, vector<16x100xf32> -> vector<16x100xf32>
    %101 = arith.addf %96, %100 : vector<16x100xf32>
    %c7_95 = arith.constant 7 : index
    %c0_96 = arith.constant 0 : index
    %c0_97 = arith.constant 0 : index
    %102 = vector.load %arg5[%c7_95, %c0_96, %c0_97] : memref<9x16x16xf32, #tpu.memory_space<vmem>>, vector<1x16x16xf32>
    %103 = vector.shape_cast %102 : vector<1x16x16xf32> to vector<16x16xf32>
    %c0_98 = arith.constant 0 : index
    %c138 = arith.constant 138 : index
    %104 = vector.load %arg10[%c0_98, %c138] : memref<16x356xf32, #tpu.memory_space<vmem>>, vector<16x100xf32>
    %cst_99 = arith.constant dense<0.000000e+00> : vector<16x100xf32>
    %105 = tpu.matmul %103, %104, %cst_99 {dimension_numbers = #tpu.dot_dimension_numbers<[1], [0], [0], [1], [0, 0, 1, 1], [], []>} : vector<16x16xf32>, vector<16x100xf32>, vector<16x100xf32> -> vector<16x100xf32>
    %106 = arith.addf %101, %105 : vector<16x100xf32>
    %c8_100 = arith.constant 8 : index
    %c0_101 = arith.constant 0 : index
    %c0_102 = arith.constant 0 : index
    %107 = vector.load %arg5[%c8_100, %c0_101, %c0_102] : memref<9x16x16xf32, #tpu.memory_space<vmem>>, vector<1x16x16xf32>
    %108 = vector.shape_cast %107 : vector<1x16x16xf32> to vector<16x16xf32>
    %c0_103 = arith.constant 0 : index
    %c139 = arith.constant 139 : index
    %109 = vector.load %arg10[%c0_103, %c139] : memref<16x356xf32, #tpu.memory_space<vmem>>, vector<16x100xf32>
    %cst_104 = arith.constant dense<0.000000e+00> : vector<16x100xf32>
    %110 = tpu.matmul %108, %109, %cst_104 {dimension_numbers = #tpu.dot_dimension_numbers<[1], [0], [0], [1], [0, 0, 1, 1], [], []>} : vector<16x16xf32>, vector<16x100xf32>, vector<16x100xf32> -> vector<16x100xf32>
    %111 = arith.addf %106, %110 : vector<16x100xf32>
    %c0_105 = arith.constant 0 : index
    %c0_106 = arith.constant 0 : index
    %112 = vector.load %arg6[%c0_105, %c0_106] : memref<16x1xf32, #tpu.memory_space<vmem>>, vector<16x1xf32>
    %113 = vector.broadcast %112 : vector<16x1xf32> to vector<16x100xf32>
    %114 = arith.addf %111, %113 : vector<16x100xf32>
    %c0_107 = arith.constant 0 : index
    %c0_108 = arith.constant 0 : index
    %c1185_109 = arith.constant 1185 : index
    %115 = vector.load %arg1[%c0_107, %c0_108, %c1185_109] : memref<1x16x1424xf32, #tpu.memory_space<vmem>>, vector<1x16x100xf32>
    %116 = vector.shape_cast %115 : vector<1x16x100xf32> to vector<16x100xf32>
    %c0_110 = arith.constant 0 : index
    %c0_111 = arith.constant 0 : index
    %117 = vector.load %arg7[%c0_110, %c0_111] : memref<16x16xf32, #tpu.memory_space<vmem>>, vector<16x16xf32>
    %cst_112 = arith.constant dense<0.000000e+00> : vector<16x100xf32>
    %118 = tpu.matmul %117, %116, %cst_112 {dimension_numbers = #tpu.dot_dimension_numbers<[1], [0], [0], [1], [0, 0, 1, 1], [], []>} : vector<16x16xf32>, vector<16x100xf32>, vector<16x100xf32> -> vector<16x100xf32>
    %119 = arith.addf %114, %118 : vector<16x100xf32>
    %c0_113 = arith.constant 0 : index
    %c0_114 = arith.constant 0 : index
    %120 = vector.load %arg8[%c0_113, %c0_114] : memref<16x1xf32, #tpu.memory_space<vmem>>, vector<16x1xf32>
    %121 = vector.broadcast %120 : vector<16x1xf32> to vector<16x100xf32>
    %122 = arith.addf %119, %121 : vector<16x100xf32>
    %cst_115 = arith.constant 0.000000e+00 : f32
    %123 = vector.broadcast %cst_115 : f32 to vector<16x100xf32>
    %124 = arith.maximumf %122, %123 : vector<16x100xf32>
    %c0_116 = arith.constant 0 : index
    %c0_117 = arith.constant 0 : index
    %c0_118 = arith.constant 0 : index
    %125 = vector.load %arg9[%c0_116, %c0_117, %c0_118] : memref<1x16x100xf32, #tpu.memory_space<vmem>>, vector<1x16x100xf32>
    %126 = vector.shape_cast %125 : vector<1x16x100xf32> to vector<16x100xf32>
    %127 = vector.shape_cast %124 : vector<16x100xf32> to vector<1x16x100xf32>
    tpu.vector_store %arg9[%c0_116, %c0_117, %c0_118], %127 {strides = array<i32>} : memref<1x16x100xf32, #tpu.memory_space<vmem>>, vector<1x16x100xf32>,
    return
  }
  func.func @transform_0(%arg0: i32) -> (i32, i32, i32) {
    %c0_i32 = arith.constant 0 : i32
    %c0_i32_0 = arith.constant 0 : i32
    %c0_i32_1 = arith.constant 0 : i32
    return %arg0, %c0_i32, %c0_i32_0 : i32, i32, i32
  }
  func.func @transform_1(%arg0: i32) -> (i32, i32, i32) {
    %c0_i32 = arith.constant 0 : i32
    %c0_i32_0 = arith.constant 0 : i32
    %c0_i32_1 = arith.constant 0 : i32
    %c0_i32_2 = arith.constant 0 : i32
    return %c0_i32, %c0_i32_0, %c0_i32_1 : i32, i32, i32
  }
  func.func @transform_2(%arg0: i32) -> (i32, i32) {
    %c0_i32 = arith.constant 0 : i32
    %c0_i32_0 = arith.constant 0 : i32
    %c0_i32_1 = arith.constant 0 : i32
    return %c0_i32, %c0_i32_0 : i32, i32
  }
  func.func @transform_3(%arg0: i32) -> (i32, i32) {
    %c0_i32 = arith.constant 0 : i32
    %c0_i32_0 = arith.constant 0 : i32
    %c0_i32_1 = arith.constant 0 : i32
    return %c0_i32, %c0_i32_0 : i32, i32
  }
  func.func @transform_4(%arg0: i32) -> (i32, i32, i32) {
    %c0_i32 = arith.constant 0 : i32
    %c0_i32_0 = arith.constant 0 : i32
    %c0_i32_1 = arith.constant 0 : i32
    %c0_i32_2 = arith.constant 0 : i32
    return %c0_i32, %c0_i32_0, %c0_i32_1 : i32, i32, i32
  }
  func.func @transform_5(%arg0: i32) -> (i32, i32) {
    %c0_i32 = arith.constant 0 : i32
    %c0_i32_0 = arith.constant 0 : i32
    %c0_i32_1 = arith.constant 0 : i32
    return %c0_i32, %c0_i32_0 : i32, i32
  }
  func.func @transform_6(%arg0: i32) -> (i32, i32) {
    %c0_i32 = arith.constant 0 : i32
    %c0_i32_0 = arith.constant 0 : i32
    %c0_i32_1 = arith.constant 0 : i32
    return %c0_i32, %c0_i32_0 : i32, i32
  }
  func.func @transform_7(%arg0: i32) -> (i32, i32) {
    %c0_i32 = arith.constant 0 : i32
    %c0_i32_0 = arith.constant 0 : i32
    %c0_i32_1 = arith.constant 0 : i32
    return %c0_i32, %c0_i32_0 : i32, i32
  }
  func.func @transform_8(%arg0: i32) -> (i32, i32, i32) {
    %c0_i32 = arith.constant 0 : i32
    %c0_i32_0 = arith.constant 0 : i32
    %c0_i32_1 = arith.constant 0 : i32
    return %arg0, %c0_i32, %c0_i32_0 : i32, i32, i32
  }
}

</mosaic_0001>

<bundles_post_ra>
// kernel: tpu_custom_call.1
= control target key start
LH: loop header
LB: loop body
LE: loop exit
PB: predicated region body
PF: predicated region fallthrough
CT: control target
= control target key end

     0   :  { %s3352_s0 = inlined_call_operand.hbm [shape: f32[2,16,1424], index: 0, kind: input, shape index: {}]   ;;  %s3353_s1 = inlined_call_operand.hbm [shape: f32[9,16,16], index: 1, kind: input, shape index: {}]   ;;  %s3354_s2 = inlined_call_operand.vmem [shape: f32[16,1], index: 2, kind: input, shape index: {}]   ;;  %s3355_s3 = inlined_call_operand.vmem [shape: f32[1,100], index: 3, kind: input, shape index: {}]   ;;  %s3356_s4 = inlined_call_operand.hbm [shape: f32[9,16,16], index: 4, kind: input, shape index: {}]   ;;  %s3357_s5 = inlined_call_operand.vmem [shape: f32[16,1], index: 5, kind: input, shape index: {}]   ;;  %s3358_s6 = inlined_call_operand.vmem [shape: f32[16,16], index: 6, kind: input, shape index: {}]   ;;  %s3359_s7 = inlined_call_operand.vmem [shape: f32[16,1], index: 7, kind: input, shape index: {}]   ;;  %s3360_s8 = inlined_call_operand.hbm [shape: f32[2,16,100], index: 8, kind: output, shape index: {}]  }
   0x1   :  { %3365 = sst [smem:[#allocation13_spill]] %s3353_s1 }
   0x2   :  { %3366 = sst [smem:[#allocation14_spill]] %s3356_s4 }
   0x3   :  { %13 = vsyncpa [#allocation4], 0 }
   0x4   :  { %15 = vsyncpa [#allocation4 + $0x1], 0 }
   0x5   :  { %16 = vsyncpa [#allocation7], 0 }
   0x6   :  { %17 = vsyncpa [#allocation5], 0 }
   0x7   :  { %19 = vsyncpa [#allocation5 + $0x1], 0  ;;  %s2963_s27 = smov 0   ;;  %s2965_s28 = smov 0  }
   0x8   :  { %s2967_s29 = smov 0   ;;  %s2969_s30 = smov 0  }
   0x9 LB: > { %s2984_s9 = sadd.s32 4294967295, %s2891_s30   ;;  %s2386_s10 = sadd.s32 4294967294, %s2891_s30   ;;  %s2891_s30 = sphi %s2969_s30, %s3386_s30   ;;  %s2887_s29 = sphi %s2967_s29, %s3385_s29   ;;  %s2883_s28 = sphi %s2965_s28, %s3384_s28   ;;  %s2879_s27 = sphi %s2963_s27, %s3383_s27  }
   0xa   : > { %p45_p0 = scmp.ne.s32.totalorder %s2883_s28, %s2879_s27  ;;  %p3361_p1 = scmp.eq.s32.totalorder %s2984_s9, 0 }
   0xb   : > { %p222_p3 = scmp.eq.s32.totalorder %s2386_s10, 1  ;;  %p2387_p5 = scmp.ge.s32.totalorder %s2891_s30, 1 }
   0xc   : > { %p2993_p4 = por %p3361_p1, %p45_p0  ;;  %p229_p7 = scmp.lt.s32.totalorder %s2891_s30, 3 }
   0xd   : > { %p2998_p6 = por %p222_p3, %p45_p0  ;;  %s2893_s14 = smov [#allocation6]  }
   0xe   : > { %s3367_s11 = scalar_select %p2993_p4, 1, 0 }
   0xf   : > { %s3368_s12 = scalar_select %p2998_p6, 1, 0 }
  0x10   : > { %p3003_p8 = pnand %p2387_p5, %p229_p7  ;;  %s241_s15 = sshll.u32 %s2893_s14, 4  ;;  %s242_s15 = int_to_ptr.vmem [resolvable:$true] %s241_s15 }
  0x11   : > { %s2894_s17 = smov [#allocation8]   ;;  %s2754_s19 = scalar_lea.vmem %s242_s15, 2304 }
  0x12   : > { %s3369_s13 = scalar_select %p3003_p8, 1, 0 }
  0x13   : > { %p2665_p9 = pneg %p3003_p8  ;;  %s260_s18 = sshll.u32 %s2894_s17, 4  ;;  %s261_s18 = int_to_ptr.vmem [resolvable:$true] %s260_s18 }
  0x14   : > { %p2755_p13 = scmp.ne.s32.totalorder %s242_s15, %s2754_s19  ;;  %p2762_p5 = scmp.lt.s32.totalorder %s242_s15, %s242_s15 }
  0x15   : > { %p3012_p11 = pnand %p2665_p9, %p3361_p1  ;;  %p2763_p7 = scmp.lt.s32.totalorder %s2754_s19, %s2754_s19 }
  0x17   : > { %p2745_p12 = pneg %p3012_p11  ;;  %p2764_p10 = por %p2763_p7, %p2762_p5 }
  0x19   : > { %p2757_p0 = pnand %p2755_p13, %p2745_p12 }
  0x1b   : > { %p2758_p3 = pneg %p2757_p0 }
  0x1d   : > { %p2765_p9 = pnand %p2764_p10, %p2758_p3 }
  0x1f   : > { %2768 = shalt.err (!%p2765_p9)
}
  0x20   : > { %s2895_s20 = smov 128   ;;  %s2896_s21 = smov 8  }
  0x21   : > { %s3371_s1 = sld [smem:[#allocation13_spill]]  ;;  %s2780_s24 = scalar_lea.vmem %s261_s18, 2304 }
  0x22   : > { %p2781_p1 = scmp.ne.s32.totalorder %s261_s18, %s2780_s24  ;;  %p2788_p2 = scmp.lt.s32.totalorder %s261_s18, %s261_s18 }
  0x23   : > { %p2789_p6 = scmp.lt.s32.totalorder %s2780_s24, %s2780_s24 }
  0x24   : > { %p2783_p13 = pnand %p2781_p1, %p2745_p12 }
  0x25   : > { %p2790_p5 = por %p2789_p6, %p2788_p2 }
  0x26   : > { %p2784_p0 = pneg %p2783_p13 }
  0x27   : > { %2668 = dma.hbm_to_vmem [thread:$0]  (!%p3012_p11), %s3371_s1, 2304, %s242_s15, [#allocation7], %s2895_s20, %s2895_s20, %s2896_s21  }
  0x28   : > { %p2791_p10 = pnand %p2790_p5, %p2784_p0 }
  0x2a   : > { %2794 = shalt.err (!%p2791_p10)
}
  0x2b   : > { %s3372_s4 = sld [smem:[#allocation14_spill]]  ;;  %s3035_s10 = sadd.s32 1, %s2891_s30  }
  0x2c   : > { %s32_s14 = sadd.s32 1, %s2887_s29  ;;  %s29_s15 = ssub.s32 %s2891_s30, %s3035_s10 }
  0x2d   : > { %p39_p1 = scmp.ne.s32.totalorder %s2887_s29, %s2883_s28  ;;  %p30_p2 = scmp.eq.s32.totalorder %s29_s15, 0 }
  0x2e   : > { %p40_p6 = scmp.eq.s32.totalorder %s2891_s30, 0  ;;  %p3373_p12 = scmp.eq.s32.totalorder %s2984_s9, 1 }
  0x2f   : > { %p2682_p7 = scmp.lt.s32.totalorder %s2891_s30, 2  ;;  %s283_s19 = sand.u32 1, %s2887_s29  }
  0x30   : > { %p3045_p3 = por %p3373_p12, %p39_p1  ;;  %p41_p9 = por %p40_p6, %p39_p1 }
  0x31   : > { %2671 = dma.hbm_to_vmem [thread:$0]  (!%p3012_p11), %s3372_s4, 2304, %s261_s18, [#allocation7], %s2895_s20, %s2895_s20, %s2896_s21  }
  0x32   : > { %s3374_s16 = scalar_select %p3045_p3, 1, 0 }
  0x33   : > { %s3051_s17 = scalar_select %p30_p2, %s2887_s29, %s32_s14  }
  0x34   : > { %s2650_s22 = smul.u32 192, %s283_s19  ;;  %p3055_p11 = pnand %p2682_p7, %p41_p9 }
  0x35   : > { %s2651_s18 = smul.u32 3072, %s2891_s30  ;;  %s3066_s14 = scalar_lea.sflag [#allocation4], %s283_s19 }
  0x36   : > { %s287_s25 = scalar_lea.vmem [#allocation3], %s2650_s22  ;;  %p2797_p0 = pneg %p3055_p11 }
  0x37   : > { %s3062_s24 = scalar_lea.hbm %s3352_s0, %s2651_s18  ;;  %s294_s26 = sshll.u32 %s287_s25, 4  ;;  %s3064_s26 = int_to_ptr.vmem [resolvable:$true] %s294_s26 }
  0x38   : > { %s2795_s15 = scalar_lea.hbm %s3062_s24, 3072  ;;  %s2800_s18 = scalar_lea.hbm %s3352_s0, 6144 }
  0x39   : > { %p2796_p13 = scmp.ne.s32.totalorder %s3062_s24, %s2795_s15  ;;  %p2801_p1 = scmp.lt.s32.totalorder %s3062_s24, %s3352_s0 }
  0x3a   : > { %p2802_p2 = scmp.lt.s32.totalorder %s2800_s18, %s2795_s15 }
  0x3b   : > { %p2798_p5 = pnand %p2797_p0, %p2796_p13 }
  0x3c   : > { %p2803_p6 = por %p2802_p2, %p2801_p1 }
  0x3d   : > { %p2799_p10 = pneg %p2798_p5 }
  0x3f   : > { %p2804_p12 = pnand %p2803_p6, %p2799_p10 }
  0x41   : > { %2807 = shalt.err (!%p2804_p12)
}
  0x42   : > { %s2808_s19 = scalar_lea.vmem %s3064_s26, 3072  ;;  %s2897_s22 = smov [#allocation3]  }
  0x43   : > { %p2809_p7 = scmp.ne.s32.totalorder %s3064_s26, %s2808_s19  ;;  %s2813_s25 = sshll.u32 %s2897_s22, 4  ;;  %s2814_s25 = int_to_ptr.vmem [resolvable:$false] %s2813_s25 }
  0x44   : > { %s2815_s1 = scalar_lea.vmem %s2814_s25, 6144  ;;  %p2816_p5 = scmp.lt.s32.totalorder %s3064_s26, %s2814_s25 }
  0x45   : > { %p2811_p9 = pnand %p2809_p7, %p2797_p0  ;;  %p2817_p3 = scmp.lt.s32.totalorder %s2815_s1, %s2808_s19 }
  0x47   : > { %p2812_p13 = pneg %p2811_p9  ;;  %p2818_p4 = por %p2817_p3, %p2816_p5 }
  0x49   : > { %p2819_p8 = pnand %p2818_p4, %p2812_p13 }
  0x4b   : > { %2822 = shalt.err (!%p2819_p8)
}
  0x4c   : > { %s2898_s4 = smov 1536   ;;  %s2899_s15 = smov 96  }
  0x4d   : > { %2675 = dma.hbm_to_vmem [thread:$0]  (!%p3055_p11), %s3062_s24, 3072, %s3064_s26, %s3066_s14, %s2898_s4, %s2898_s4, %s2899_s15  }
  0x4e   : > { %p3376_p0 = scmp.ne.s32.totalorder %s3369_s13, 0 }
  0x4f   : > { %s3090_s21 = sand.u32 (!%p3376_p0), 1, %s2883_s28   ;;  %p3377_p4 = scmp.ne.s32.totalorder (!%p3376_p0), %s3367_s11, 0 }
  0x50   : > { %306 = sbr.rel (%p3376_p0) target bundleno = 865 (0x361), region = 52  ;;  %s309_s23 = scalar_lea.sflag (!%p3376_p0), [#allocation4], %s3090_s21 }
  0x51   : > { %s2652_s18 = smul.u32 (!%p3376_p0), 192, %s3090_s21 }
  0x53   : > { %s3094_s19 = scalar_lea.vmem (!%p3376_p0), [#allocation3], %s2652_s18 }
  0x55   : > { %2866 = dma.done.wait (%p3377_p4), %s309_s23, 3072  }
  0x56   : > { %2868 = vsyncadd (%p3377_p4), %s309_s23, 4294964224  ;;  %p3378_p8 = scmp.eq.s32.totalorder %s2984_s9, 0 }
  0x58   : > { %2870 = dma.done.wait (%p3378_p8), [#allocation7], 4608   ;;  %p3379_p3 = pmov %p3378_p8 }
  0x59   : > { %v361_v0 = vld [vmem:[%s3094_s19 + $0x78] sm:$0xff]  ;;  %s2900_s13 = smov 39   ;;  %v362_v2 = vld [vmem:[%s3094_s19 + $0x80] sm:$0xff]  ;;  %vm383_vm0 = vcmask 130048   ;;  %v364_v4 = vld [vmem:[#allocation6 + $0x10] sm:$0xff]  ;;  %s2901_s11 = smov 11  }
  0x5a   : > { %2872 = vsyncadd (%p3379_p3), [#allocation7], 4294962688  ;;  %v359_v1 = vld [vmem:[%s3094_s19 + $0x18] sm:$0xff]  ;;  %374 = vrot.lane.b32.xlu0 %v361_v0, %s2900_s13  ;;  %v360_v3 = vld [vmem:[%s3094_s19 + $0x20] sm:$0xff]  ;;  %2521 = vmatprep.mubr.msk.f32.mxu0 %vm383_vm0, %v364_v4  ;;  %s2902_s20 = smov 10   ;;  %s2903_s24 = smov 67  }
  0x5b   : > { %370 = vrot.lane.b32.xlu1 %v359_v1, %s2900_s13  ;;  %v3109_v5 = vld [vmem:[%s3094_s19 + $0x68] sm:$0xff]  ;;  %v355_v6 = vld [vmem:[%s3094_s19 + $0x60] sm:$0xff]  ;;  %v665_v10 = vld [vmem:[%s3094_s19 + $0x98] sm:$0xff]  ;;  %s2904_s26 = smov 95   ;;  %s2905_s14 = smov 66   ;;  %v2907_v18 = vmov 0  }
  0x5c   : > { %v3117_v7 = vld [vmem:[%s3094_s19 + $0x8] sm:$0xff]  ;;  %v353_v8 = vld [vmem:[%s3094_s19] sm:$0xff]  ;;  %v664_v11 = vld [vmem:[%s3094_s19 + $0x90] sm:$0xff]  ;;  %s2906_s22 = smov 1   ;;  %2741 = vset.pattern.permute.xlu0 %v2907_v18  ;;  %2742 = vset.pattern.permute.xlu1 %v2907_v18  ;;  %s2908_s25 = smov 29   ;;  %vm378_vm1 = vcmask 318464  }
  0x5d   : > { %v357_v9 = vld [vmem:[#allocation6] sm:$0xff]  ;;  %v663_v12 = vld [vmem:[%s3094_s19 + $0x38] sm:$0xff]  ;;  %v662_v13 = vld [vmem:[%s3094_s19 + $0x30] sm:$0xff]  ;;  %vm477_vm2 = vcmask 89088   ;;  %vm574_vm3 = vcmask 80896   ;;  %vm681_vm4 = vcmask 547840  }
  0x5e   : > { %376 = vrot.lane.b32.xlu0 %v362_v2, %s2900_s13  ;;  %2528 = vmatprep.mubr.msk.f32.mxu1 %vm383_vm0, %v357_v9  ;;  %v3135_v14 = vld [vmem:[%s3094_s19 + $0xb0] sm:$0xff]  ;;  %v3138_v15 = vld [vmem:[%s3094_s19 + $0xa8] sm:$0xff]  ;;  %v1260_v19 = vld [vmem:[%s3354_s2 + $0x8] sm:$0xff]  ;;  %vm788_vm5 = vcmask 777216   ;;  %vm887_vm6 = vcmask 539648   ;;  %vm986_vm7 = vcmask 7168  }
  0x5f   : > { %372 = vrot.lane.b32.xlu1 %v360_v3, %s2900_s13  ;;  %v3145_v16 = vld [vmem:[%s3094_s19 + $0x50] sm:$0xff]  ;;  %v3148_v17 = vld [vmem:[%s3094_s19 + $0x48] sm:$0xff]  ;;  %v365_v27 = vld [vmem:[#allocation6 + $0x18] sm:$0xff]  ;;  %vm1085_vm8 = vcmask 236544   ;;  %s2910_s23 = smov 9   ;;  %vm1286_vm9 = vcmask 818176  }
  0x60   : > { %v1259_v20 = vld [vmem:[%s3354_s2] sm:$0xff]  ;;  %v564_v30 = vld [vmem:[#allocation6 + $0x20] sm:$0xff]  ;;  %v358_v35 = vld [vmem:[#allocation6 + $0x8] sm:$0xff]  ;;  %s2914_s1 = smov 117   ;;  %vm1503_vm10 = vcmask 72704   ;;  %p3380_p10 = scmp.ne.s32.totalorder %s3374_s16, 0 }
  0x61   : > { %v667_v36 = vld [vmem:[#allocation6 + $0x30] sm:$0xff]  ;;  %v565_v43 = vld [vmem:[#allocation6 + $0x28] sm:$0xff]  ;;  %v774_v44 = vld [vmem:[#allocation6 + $0x40] sm:$0xff] }
  0x62   : > { %473 = vrot.lane.b32.xlu0 %v355_v6, %s2901_s11  ;;  %v668_v51 = vld [vmem:[#allocation6 + $0x38] sm:$0xff]  ;;  %v877_v52 = vld [vmem:[#allocation6 + $0x50] sm:$0xff]  ;;  %v775_v59 = vld [vmem:[#allocation6 + $0x48] sm:$0xff] }
  0x63   : > { %475 = vrot.lane.b32.xlu1 %v3109_v5, %s2901_s11  ;;  %v976_v60 = vld [vmem:[#allocation6 + $0x60] sm:$0xff]  ;;  %v1075_v4 = vld [vmem:[#allocation6 + $0x70] sm:$0xff] }
  0x64   : > { %v1174_v18 = vld [vmem:[#allocation6 + $0x80] sm:$0xff] }
  0x66   : > { %469 = vrot.lane.b32.xlu0 %v353_v8, %s2901_s11 }
  0x67   : > { %471 = vrot.lane.b32.xlu1 %v3117_v7, %s2901_s11 }
  0x6a   : > { %570 = vrot.lane.b32.xlu0 %v355_v6, %s2902_s20 }
  0x6b   : > { %572 = vrot.lane.b32.xlu1 %v3109_v5, %s2902_s20 }
  0x6e   : > { %566 = vrot.lane.b32.xlu0 %v353_v8, %s2902_s20 }
  0x6f   : > { %568 = vrot.lane.b32.xlu1 %v3117_v7, %s2902_s20 }
  0x72   : > { %677 = vrot.lane.b32.xlu0 %v664_v11, %s2903_s24 }
  0x73   : > { %679 = vrot.lane.b32.xlu1 %v665_v10, %s2903_s24 }
  0x76   : > { %673 = vrot.lane.b32.xlu0 %v662_v13, %s2903_s24 }
  0x77   : > { %675 = vrot.lane.b32.xlu1 %v663_v12, %s2903_s24  ;;  %s2911_s24 = smov 127  }
  0x7a   : > { %784 = vrot.lane.b32.xlu0 %v3138_v15, %s2904_s26 }
  0x7b   : > { %786 = vrot.lane.b32.xlu1 %v3135_v14, %s2904_s26 }
  0x7e   : > { %780 = vrot.lane.b32.xlu0 %v3148_v17, %s2904_s26 }
  0x7f   : > { %782 = vrot.lane.b32.xlu1 %v3145_v16, %s2904_s26 }
  0x82   : > { %883 = vrot.lane.b32.xlu0 %v664_v11, %s2905_s14 }
  0x83   : > { %885 = vrot.lane.b32.xlu1 %v665_v10, %s2905_s14 }
  0x86   : > { %879 = vrot.lane.b32.xlu0 %v662_v13, %s2905_s14  ;;  %v977_v13 = vld [vmem:[#allocation6 + $0x68] sm:$0xff] }
  0x87   : > { %881 = vrot.lane.b32.xlu1 %v663_v12, %s2905_s14  ;;  %s2912_s14 = smov 119  }
  0x8a   : > { %982 = vrot.lane.b32.xlu0 %v355_v6, %s2906_s22 }
  0x8b   : > { %984 = vrot.lane.b32.xlu1 %v3109_v5, %s2906_s22 }
  0x8e   : > { %978 = vrot.lane.b32.xlu0 %v353_v8, %s2906_s22 }
  0x8f   : > { %980 = vrot.lane.b32.xlu1 %v3117_v7, %s2906_s22 }
  0x92   : > { %1081 = vrot.lane.b32.xlu0 %v361_v0, %s2908_s25 }
  0x93   : > { %1083 = vrot.lane.b32.xlu1 %v362_v2, %s2908_s25 }
  0x96   : > { %1077 = vrot.lane.b32.xlu0 %v359_v1, %s2908_s25 }
  0x97   : > { %1079 = vrot.lane.b32.xlu1 %v360_v3, %s2908_s25  ;;  %v878_v3 = vld [vmem:[#allocation6 + $0x58] sm:$0xff]  ;;  %s2913_s25 = smov 118  }
  0x9a   : > { %1268 = vperm.xlu0 %2741, %v1260_v19  }
  0x9b   : > { %1263 = vperm.xlu1 %2742, %v1259_v20  }
  0xcc   : > { %v375_v21 = vpop.permute.xlu0 %374 }
  0xcd   : > { %v371_v22 = vpop.permute.xlu1 %370 }
  0xd0   : > { %v377_v23 = vpop.permute.xlu0 %376 }
  0xd1   : > { %v373_v24 = vpop.permute.xlu1 %372  ;;  %v380_v25 = vsel %vm378_vm1, %v375_v21, %v377_v23 }
  0xd2   : > { %2517 = vmatprep.subr.mxu0 %v380_v25  ;;  %v379_v26 = vsel %vm378_vm1, %v371_v22, %v373_v24  ;;  %v1175_v22 = vld [vmem:[#allocation6 + $0x88] sm:$0xff] }
  0xd3   : > { %2518 = vmatpush3.msra.mxu0 %v380_v25 }
  0xd4   : > { %2519 = vmatprep.subr.mxu0 %v379_v26  ;;  %v474_v29 = vpop.permute.xlu0 %473 }
  0xd5   : > { %v476_v28 = vpop.permute.xlu1 %475  ;;  %2520 = vmatpush3.msra.mxu0 %v379_v26  ;;  %v1076_v26 = vld [vmem:[#allocation6 + $0x78] sm:$0xff] }
  0xd6   : > { %v479_v31 = vsel %vm477_vm2, %v474_v29, %v476_v28  ;;  %2522 = vmatmul.mubr.msk.f32.vlgmr.msra.gmra.mxu0 %vm383_vm0, %v365_v27 }
  0xd7   : > { %2524 = vmatprep.subr.mxu1 %v479_v31  ;;  %2535 = vmatprep.mubr.msk.f32.mxu0 %vm383_vm0, %v564_v30 }
  0xd8   : > { %2525 = vmatpush3.msra.mxu1 %v479_v31  ;;  %v470_v33 = vpop.permute.xlu0 %469 }
  0xd9   : > { %v472_v32 = vpop.permute.xlu1 %471 }
  0xda   : > { %v478_v34 = vsel %vm477_vm2, %v470_v33, %v472_v32 }
  0xdb   : > { %2526 = vmatprep.subr.mxu1 %v478_v34 }
  0xdc   : > { %2527 = vmatpush3.msra.mxu1 %v478_v34  ;;  %v571_v38 = vpop.permute.xlu0 %570 }
  0xdd   : > { %v573_v37 = vpop.permute.xlu1 %572  ;;  %2529 = vmatmul.mubr.msk.f32.vlgmr.msra.gmra.mxu1 %vm383_vm0, %v358_v35 }
  0xde   : > { %v576_v39 = vsel %vm574_vm3, %v571_v38, %v573_v37  ;;  %2542 = vmatprep.mubr.msk.f32.mxu1 %vm383_vm0, %v667_v36 }
  0xdf   : > { %2531 = vmatprep.subr.mxu0 %v576_v39 }
  0xe0   : > { %2532 = vmatpush3.msra.mxu0 %v576_v39  ;;  %v567_v41 = vpop.permute.xlu0 %566 }
  0xe1   : > { %v569_v40 = vpop.permute.xlu1 %568 }
  0xe2   : > { %v575_v42 = vsel %vm574_vm3, %v567_v41, %v569_v40 }
  0xe3   : > { %2533 = vmatprep.subr.mxu0 %v575_v42 }
  0xe4   : > { %2534 = vmatpush3.msra.mxu0 %v575_v42  ;;  %v678_v46 = vpop.permute.xlu0 %677 }
  0xe5   : > { %v680_v45 = vpop.permute.xlu1 %679  ;;  %2536 = vmatmul.mubr.msk.f32.vlgmr.msra.gmra.mxu0 %vm383_vm0, %v565_v43 }
  0xe6   : > { %v683_v47 = vsel %vm681_vm4, %v678_v46, %v680_v45  ;;  %2549 = vmatprep.mubr.msk.f32.mxu0 %vm383_vm0, %v774_v44 }
  0xe7   : > { %2538 = vmatprep.subr.mxu1 %v683_v47 }
  0xe8   : > { %2539 = vmatpush3.msra.mxu1 %v683_v47  ;;  %v674_v49 = vpop.permute.xlu0 %673 }
  0xe9   : > { %v676_v48 = vpop.permute.xlu1 %675 }
  0xea   : > { %v682_v50 = vsel %vm681_vm4, %v674_v49, %v676_v48 }
  0xeb   : > { %2540 = vmatprep.subr.mxu1 %v682_v50 }
  0xec   : > { %2541 = vmatpush3.msra.mxu1 %v682_v50  ;;  %v785_v54 = vpop.permute.xlu0 %784 }
  0xed   : > { %v787_v53 = vpop.permute.xlu1 %786  ;;  %2543 = vmatmul.mubr.msk.f32.vlgmr.msra.gmra.mxu1 %vm383_vm0, %v668_v51 }
  0xee   : > { %v790_v55 = vsel %vm788_vm5, %v785_v54, %v787_v53  ;;  %2556 = vmatprep.mubr.msk.f32.mxu1 %vm383_vm0, %v877_v52 }
  0xef   : > { %2545 = vmatprep.subr.mxu0 %v790_v55 }
  0xf0   : > { %2546 = vmatpush3.msra.mxu0 %v790_v55  ;;  %v781_v57 = vpop.permute.xlu0 %780 }
  0xf1   : > { %v783_v56 = vpop.permute.xlu1 %782 }
  0xf2   : > { %v789_v58 = vsel %vm788_vm5, %v781_v57, %v783_v56 }
  0xf3   : > { %2547 = vmatprep.subr.mxu0 %v789_v58 }
  0xf4   : > { %2548 = vmatpush3.msra.mxu0 %v789_v58  ;;  %v884_v62 = vpop.permute.xlu0 %883 }
  0xf5   : > { %v886_v61 = vpop.permute.xlu1 %885  ;;  %2550 = vmatmul.mubr.msk.f32.vlgmr.msra.gmra.mxu0 %vm383_vm0, %v775_v59 }
  0xf6   : > { %v889_v63 = vsel %vm887_vm6, %v884_v62, %v886_v61  ;;  %2563 = vmatprep.mubr.msk.f32.mxu0 %vm383_vm0, %v976_v60 }
  0xf7   : > { %2552 = vmatprep.subr.mxu1 %v889_v63 }
  0xf8   : > { %2553 = vmatpush3.msra.mxu1 %v889_v63  ;;  %v880_v1 = vpop.permute.xlu0 %879  ;;  %v2414_v63 = vld [vmem:[%s3355_s3] ss:$0 sm:$0xff] }
  0xf9   : > { %v882_v0 = vpop.permute.xlu1 %881 }
  0xfa   : > { %v888_v2 = vsel %vm887_vm6, %v880_v1, %v882_v0 }
  0xfb   : > { %2554 = vmatprep.subr.mxu1 %v888_v2 }
  0xfc   : > { %2555 = vmatpush3.msra.mxu1 %v888_v2  ;;  %v983_v8 = vpop.permute.xlu0 %982 }
  0xfd   : > { %v985_v6 = vpop.permute.xlu1 %984  ;;  %2557 = vmatmul.mubr.msk.f32.vlgmr.msra.gmra.mxu1 %vm383_vm0, %v878_v3 }
  0xfe   : > { %v988_v9 = vsel %vm986_vm7, %v983_v8, %v985_v6  ;;  %2570 = vmatprep.mubr.msk.f32.mxu1 %vm383_vm0, %v1075_v4  ;;  %v1300_v8 = vld [vmem:[#allocation8 + $0x10] sm:$0xff] }
  0xff   : > { %2559 = vmatprep.subr.mxu0 %v988_v9 }
 0x100   : > { %2560 = vmatpush3.msra.mxu0 %v988_v9  ;;  %v979_v11 = vpop.permute.xlu0 %978  ;;  %v1293_v9 = vld [vmem:[#allocation8] sm:$0xff] }
 0x101   : > { %v981_v10 = vpop.permute.xlu1 %980 }
 0x102   : > { %v987_v12 = vsel %vm986_vm7, %v979_v11, %v981_v10  ;;  %v2143_v11 = vld [vmem:[%s3357_s5] sm:$0xff] }
 0x103   : > { %2561 = vmatprep.subr.mxu0 %v987_v12 }
 0x104   : > { %2562 = vmatpush3.msra.mxu0 %v987_v12  ;;  %v1082_v20 = vpop.permute.xlu0 %1081 }
 0x105   : > { %v1084_v19 = vpop.permute.xlu1 %1083  ;;  %2564 = vmatmul.mubr.msk.f32.vlgmr.msra.gmra.mxu0 %vm383_vm0, %v977_v13  ;;  %2573 = vmatprep.subr.mxu0 %v3109_v5 }
 0x106   : > { %v1087_v21 = vsel %vm1085_vm8, %v1082_v20, %v1084_v19  ;;  %2574 = vmatpush3.msra.mxu0 %v3109_v5  ;;  %2577 = vmatprep.mubr.msk.f32.mxu0 %vm383_vm0, %v1174_v18  ;;  %v2909_v5 = vmov 0.0  }
 0x107   : > { %2566 = vmatprep.subr.mxu1 %v1087_v21  ;;  %2575 = vmatprep.subr.mxu0 %v3117_v7  ;;  %1285 = vst [vmem:[#allocation2 + $0x8] sm:$0xff] %v2909_v5  ;;  %1289 = vst [vmem:[#allocation2 + $0x20] sm:$0xff] %v2909_v5 }
 0x108   : > { %2567 = vmatpush3.msra.mxu1 %v1087_v21  ;;  %2576 = vmatpush3.msra.mxu0 %v3117_v7  ;;  %v1078_v24 = vpop.permute.xlu0 %1077 }
 0x109   : > { %v1080_v23 = vpop.permute.xlu1 %1079  ;;  %2578 = vmatmul.mubr.msk.f32.vlgmr.msra.gmra.mxu0 %vm383_vm0, %v1175_v22  ;;  %1310 = vrot.lane.b32.xlu1 %v2909_v5, %s2902_s20 }
 0x10a   : > { %v1086_v25 = vsel %vm1085_vm8, %v1078_v24, %v1080_v23  ;;  %2591 = vmatprep.mubr.msk.f32.mxu0 %vm383_vm0, %v1293_v9 }
 0x10b   : > { %2568 = vmatprep.subr.mxu1 %v1086_v25 }
 0x10c   : > { %2569 = vmatpush3.msra.mxu1 %v1086_v25 }
 0x10d   : > { %2571 = vmatmul.mubr.msk.f32.vlgmr.msra.gmra.mxu1 %vm383_vm0, %v1076_v26  ;;  %1306 = vrot.lane.b32.xlu1 %v2909_v5, %s2902_s20 }
 0x10e   : > { %2584 = vmatprep.mubr.msk.f32.mxu1 %vm383_vm0, %v1300_v8 }
 0x111   : > { %1403 = vrot.lane.b32.xlu1 %v2909_v5, %s2901_s11 }
 0x115   : > { %1399 = vrot.lane.b32.xlu1 %v2909_v5, %s2901_s11  ;;  %v1269_v56 = vpop.permute.xlu0 %1268 }
 0x116   : > { %v1264_v60 = vpop.permute.xlu1 %1263 }
 0x119   : > { %1499 = vrot.lane.b32.xlu1 %v2909_v5, %s2910_s23 }
 0x11d   : > { %1495 = vrot.lane.b32.xlu1 %v2909_v5, %s2910_s23 }
 0x121   : > { %1598 = vrot.lane.b32.xlu1 %v2909_v5, %s2906_s22 }
 0x125   : > { %1594 = vrot.lane.b32.xlu1 %v2909_v5, %s2906_s22 }
 0x17b   : > { %v1311_v12 = vpop.permute.xlu1 %1310 }
 0x17f   : > { %v1307_v13 = vpop.permute.xlu1 %1306 }
 0x183   : > { %v1404_v18 = vpop.permute.xlu1 %1403 }
 0x187   : > { %v1400_v19 = vpop.permute.xlu1 %1399 }
 0x18b   : > { %v1500_v20 = vpop.permute.xlu1 %1499 }
 0x18f   : > { %v1496_v22 = vpop.permute.xlu1 %1495 }
 0x193   : > { %v1599_v25 = vpop.permute.xlu1 %1598 }
 0x196   : > { %v2523_v7 = vpop.f32.mrf.mxu0 }
 0x198   : > { %v456_v27 = vpop.f32.mrf.mxu0 }
 0x19d   : > { %v2530_v28 = vpop.f32.mrf.mxu1 }
 0x19e   : > { %v560_v31 = vadd.f32 %v2530_v28, %v2523_v7  ;;  %v1595_v7 = vpop.permute.xlu1 %1594 }
 0x19f   : > { %v554_v29 = vpop.f32.mrf.mxu1 }
 0x1a0   : > { %v555_v32 = vadd.f32 %v554_v29, %v456_v27 }
 0x1a5   : > { %v2537_v30 = vpop.f32.mrf.mxu0 }
 0x1a6   : > { %v661_v35 = vadd.f32 %v2537_v30, %v560_v31  ;;  %v1301_v31 = vld [vmem:[#allocation8 + $0x18] sm:$0xff] }
 0x1a7   : > { %v651_v33 = vpop.f32.mrf.mxu0 }
 0x1a8   : > { %v660_v36 = vadd.f32 %v651_v33, %v555_v32  ;;  %v1493_v32 = vld [vmem:[#allocation8 + $0x20] sm:$0xff] }
 0x1ad   : > { %v2544_v34 = vpop.f32.mrf.mxu1 }
 0x1ae   : > { %v768_v39 = vadd.f32 %v2544_v34, %v661_v35 }
 0x1af   : > { %v758_v37 = vpop.f32.mrf.mxu1 }
 0x1b0   : > { %v767_v40 = vadd.f32 %v758_v37, %v660_v36  ;;  %v1294_v37 = vld [vmem:[#allocation8 + $0x8] sm:$0xff] }
 0x1b5   : > { %v2551_v38 = vpop.f32.mrf.mxu0 }
 0x1b6   : > { %v875_v43 = vadd.f32 %v2551_v38, %v768_v39  ;;  %v1592_v38 = vld [vmem:[#allocation8 + $0x30] sm:$0xff] }
 0x1b7   : > { %v865_v41 = vpop.f32.mrf.mxu0 }
 0x1b8   : > { %v874_v44 = vadd.f32 %v865_v41, %v767_v40 }
 0x1bd   : > { %v2558_v42 = vpop.f32.mrf.mxu1 }
 0x1be   : > { %v974_v47 = vadd.f32 %v2558_v42, %v875_v43  ;;  %v1494_v42 = vld [vmem:[#allocation8 + $0x28] sm:$0xff]  ;;  %v1690_v43 = vld [vmem:[#allocation8 + $0x40] sm:$0xff] }
 0x1bf   : > { %v964_v45 = vpop.f32.mrf.mxu1 }
 0x1c0   : > { %v973_v48 = vadd.f32 %v964_v45, %v874_v44 }
 0x1c5   : > { %v2565_v46 = vpop.f32.mrf.mxu0 }
 0x1c6   : > { %v1073_v50 = vadd.f32 %v2565_v46, %v974_v47  ;;  %v1593_v47 = vld [vmem:[#allocation8 + $0x38] sm:$0xff] }
 0x1c7   : > { %v1063_v49 = vpop.f32.mrf.mxu0 }
 0x1c8   : > { %v1072_v53 = vadd.f32 %v1063_v49, %v973_v48  ;;  %v1691_v48 = vld [vmem:[#allocation8 + $0x48] sm:$0xff] }
 0x1c9   : > { %v2579_v52 = vpop.f32.mrf.mxu0 }
 0x1cb   : > { %v1248_v59 = vpop.f32.mrf.mxu0 }
 0x1cd   : > { %v2572_v51 = vpop.f32.mrf.mxu1 }
 0x1ce   : > { %v1172_v54 = vadd.f32 %v2572_v51, %v1073_v50  ;;  %v1776_v50 = vld [vmem:[#allocation8 + $0x50] sm:$0xff] }
 0x1cf   : > { %v1162_v55 = vpop.f32.mrf.mxu1 }
 0x1d0   : > { %v1258_v57 = vadd.f32 %v2579_v52, %v1172_v54  ;;  %v1171_v58 = vadd.f32 %v1162_v55, %v1072_v53  ;;  %v1868_v52 = vld [vmem:[#allocation8 + $0x60] sm:$0xff]  ;;  %v1777_v53 = vld [vmem:[#allocation8 + $0x58] sm:$0xff]  ;;  %v1960_v55 = vld [vmem:[#allocation8 + $0x70] sm:$0xff] }
 0x1d2   : > { %v1257_v61 = vadd.f32 %v1248_v59, %v1171_v58  ;;  %v1272_v62 = vadd.f32 %v1269_v56, %v1258_v57  ;;  %v1869_v56 = vld [vmem:[#allocation8 + $0x68] sm:$0xff]  ;;  %v2052_v58 = vld [vmem:[#allocation8 + $0x80] sm:$0xff] }
 0x1d4   : > { %v1274_v0 = vmax.f32 %v1272_v62, 0.0  ;;  %v1271_v1 = vadd.f32 %v1264_v60, %v1257_v61  ;;  %v1961_v60 = vld [vmem:[#allocation8 + $0x78] sm:$0xff]  ;;  %v2161_v61 = vld [vmem:[%s3358_s6] sm:$0xff] }
 0x1d6   : > { %v1283_v2 = vmul.f32 %v2414_v63, %v1274_v0  ;;  %v1273_v3 = vmax.f32 %v1271_v1, 0.0  ;;  %v2053_v0 = vld [vmem:[#allocation8 + $0x88] sm:$0xff] }
 0x1d8   : > { %1292 = vst.msk [vmem:[#allocation2 + $0x20] sm:$0xff] %vm1286_vm9, %v1283_v2  ;;  %v1282_v4 = vmul.f32 %v2414_v63, %v1273_v3 }
 0x1da   : > { %1291 = vst.msk [vmem:[#allocation2 + $0x8] sm:$0xff] %vm1286_vm9, %v1282_v4  ;;  %v2162_v4 = vld [vmem:[%s3358_s6 + $0x8] sm:$0xff] }
 0x1df   : > { %v3209_v6 = vld [vmem:[#allocation2 + $0x20] sm:$0xff] }
 0x1e0   : > { %1780 = vrot.lane.b32.xlu1 %v3209_v6, %s2911_s24  ;;  %1312 = vrot.lane.b32.xlu0 %v3209_v6, %s2902_s20 }
 0x1e1   : > { %v3229_v10 = vld [vmem:[#allocation2 + $0x8] sm:$0xff] }
 0x1e4   : > { %1872 = vrot.lane.b32.xlu1 %v3209_v6, %s2912_s14  ;;  %1405 = vrot.lane.b32.xlu0 %v3209_v6, %s2901_s11 }
 0x1e8   : > { %1964 = vrot.lane.b32.xlu1 %v3209_v6, %s2913_s25  ;;  %1501 = vrot.lane.b32.xlu0 %v3209_v6, %s2910_s23 }
 0x1ec   : > { %2056 = vrot.lane.b32.xlu1 %v3209_v6, %s2914_s1  ;;  %1600 = vrot.lane.b32.xlu0 %v3209_v6, %s2906_s22 }
 0x1f0   : > { %2171 = vrot.lane.b32.xlu1 %v3138_v15, %s2904_s26  ;;  %2173 = vrot.lane.b32.xlu0 %v3135_v14, %s2904_s26  ;;  %v2262_v14 = vld [vmem:[%s3359_s7] sm:$0xff]  ;;  %v2144_v15 = vld [vmem:[%s3357_s5 + $0x8] sm:$0xff] }
 0x1f4   : > { %2167 = vrot.lane.b32.xlu1 %v3148_v17, %s2904_s26  ;;  %1308 = vrot.lane.b32.xlu0 %v3229_v10, %s2902_s20  ;;  %v2263_v17 = vld [vmem:[%s3359_s7 + $0x8] sm:$0xff] }
 0x1f8   : > { %2147 = vperm.xlu1 %2742, %v2143_v11   ;;  %1401 = vrot.lane.b32.xlu0 %v3229_v10, %s2901_s11 }
 0x1fc   : > { %2266 = vperm.xlu1 %2742, %v2262_v14   ;;  %1497 = vrot.lane.b32.xlu0 %v3229_v10, %s2910_s23  ;;  %s2915_s23 = smov [#allocation9]  }
 0x1fd   : > { %s2827_s13 = sshll.u32 %s2915_s23, 4  ;;  %s2828_s13 = int_to_ptr.vmem [resolvable:$false] %s2827_s13 }
 0x200   : > { %1596 = vrot.lane.b32.xlu0 %v3229_v10, %s2906_s22 }
 0x204   : > { %1778 = vrot.lane.b32.xlu0 %v3229_v10, %s2911_s24 }
 0x208   : > { %1870 = vrot.lane.b32.xlu0 %v3229_v10, %s2912_s14 }
 0x20c   : > { %1962 = vrot.lane.b32.xlu0 %v3229_v10, %s2913_s25  ;;  %s2395_s25 = sshll.u32 %s3090_s21, 4 }
 0x20d   : > { %s352_s4 = scalar_lea.vmem [#allocation9], %s2395_s25 }
 0x20e   : > { %s2294_s15 = sshll.u32 %s352_s4, 4  ;;  %s3307_s15 = int_to_ptr.vmem [resolvable:$true] %s2294_s15 }
 0x20f   : > { %s2823_s20 = scalar_lea.vmem %s3307_s15, 256  ;;  %p2830_p6 = scmp.lt.s32.totalorder %s3307_s15, %s2828_s13 }
 0x210   : > { %2054 = vrot.lane.b32.xlu0 %v3229_v10, %s2914_s1  ;;  %s2440_s1 = sshll.u32 %s2984_s9, 8  ;;  %s2281_s9 = scalar_lea.sflag [#allocation5], %s3090_s21 }
 0x211   : > { %s3305_s11 = scalar_lea.hbm %s3360_s8, %s2440_s1  ;;  %p2824_p11 = scmp.ne.s32.totalorder %s3307_s15, %s2823_s20 }
 0x213   : > { %p2825_p1 = pnand %p2824_p11, %p3380_p10 }
 0x214   : > { %2169 = vrot.lane.b32.xlu0 %v3145_v16, %s2904_s26  ;;  %s2829_s26 = scalar_lea.vmem %s2828_s13, 512 }
 0x215   : > { %p2826_p2 = pneg %p2825_p1  ;;  %p2831_p12 = scmp.lt.s32.totalorder %s2829_s26, %s2823_s20 }
 0x217   : > { %p2832_p7 = por %p2831_p12, %p2830_p6 }
 0x218   : > { %2152 = vperm.xlu0 %2741, %v2144_v15  }
 0x219   : > { %p2833_p9 = pnand %p2832_p7, %p2826_p2 }
 0x21c   : > { %2271 = vperm.xlu0 %2741, %v2263_v17  }
 0x252   : > { %v1313_v21 = vpop.permute.xlu0 %1312  ;;  %v1781_v28 = vpop.permute.xlu1 %1780 }
 0x253   : > { %v1315_v23 = vsel %vm574_vm3, %v1311_v12, %v1313_v21 }
 0x254   : > { %2580 = vmatprep.subr.mxu1 %v1315_v23 }
 0x255   : > { %2581 = vmatpush3.msra.mxu1 %v1315_v23 }
 0x256   : > { %v1406_v16 = vpop.permute.xlu0 %1405  ;;  %v1873_v35 = vpop.permute.xlu1 %1872 }
 0x257   : > { %v1408_v24 = vsel %vm477_vm2, %v1404_v18, %v1406_v16 }
 0x258   : > { %2587 = vmatprep.subr.mxu0 %v1408_v24 }
 0x259   : > { %2588 = vmatpush3.msra.mxu0 %v1408_v24 }
 0x25a   : > { %v1502_v26 = vpop.permute.xlu0 %1501  ;;  %v1965_v44 = vpop.permute.xlu1 %1964 }
 0x25b   : > { %v1505_v33 = vsel %vm1503_vm10, %v1500_v20, %v1502_v26 }
 0x25e   : > { %v1601_v5 = vpop.permute.xlu0 %1600  ;;  %v2057_v51 = vpop.permute.xlu1 %2056 }
 0x25f   : > { %v1603_v39 = vsel %vm986_vm7, %v1599_v25, %v1601_v5 }
 0x262   : > { %v3261_v27 = vpop.permute.xlu0 %2173  ;;  %v2172_v57 = vpop.permute.xlu1 %2171 }
 0x263   : > { %v2176_v62 = vsel %vm788_vm5, %v2172_v57, %v3261_v27 }
 0x266   : > { %v1309_v29 = vpop.permute.xlu0 %1308  ;;  %v2168_v1 = vpop.permute.xlu1 %2167 }
 0x267   : > { %v1314_v30 = vsel %vm574_vm3, %v1307_v13, %v1309_v29 }
 0x268   : > { %2582 = vmatprep.subr.mxu1 %v1314_v30 }
 0x269   : > { %2583 = vmatpush3.msra.mxu1 %v1314_v30 }
 0x26a   : > { %2594 = vmatprep.subr.mxu1 %v1505_v33  ;;  %v1402_v34 = vpop.permute.xlu0 %1401  ;;  %2585 = vmatmul.mubr.msk.f32.vlgmr.msra.gmra.mxu1 %vm383_vm0, %v1301_v31 }
 0x26b   : > { %2595 = vmatpush3.msra.mxu1 %v1505_v33  ;;  %v1407_v36 = vsel %vm477_vm2, %v1400_v19, %v1402_v34  ;;  %2598 = vmatprep.mubr.msk.f32.mxu1 %vm383_vm0, %v1493_v32 }
 0x26c   : > { %2589 = vmatprep.subr.mxu0 %v1407_v36 }
 0x26d   : > { %2590 = vmatpush3.msra.mxu0 %v1407_v36 }
 0x26e   : > { %2601 = vmatprep.subr.mxu0 %v1603_v39  ;;  %v1498_v40 = vpop.permute.xlu0 %1497  ;;  %2592 = vmatmul.mubr.msk.f32.vlgmr.msra.gmra.mxu0 %vm383_vm0, %v1294_v37 }
 0x26f   : > { %2602 = vmatpush3.msra.mxu0 %v1603_v39  ;;  %v1504_v41 = vsel %vm1503_vm10, %v1496_v22, %v1498_v40  ;;  %2605 = vmatprep.mubr.msk.f32.mxu0 %vm383_vm0, %v1592_v38 }
 0x270   : > { %2596 = vmatprep.subr.mxu1 %v1504_v41 }
 0x271   : > { %2597 = vmatpush3.msra.mxu1 %v1504_v41 }
 0x272   : > { %2608 = vmatprep.subr.mxu1 %v3209_v6  ;;  %v1597_v45 = vpop.permute.xlu0 %1596  ;;  %2599 = vmatmul.mubr.msk.f32.vlgmr.msra.gmra.mxu1 %vm383_vm0, %v1494_v42 }
 0x273   : > { %2609 = vmatpush3.msra.mxu1 %v3209_v6  ;;  %v1602_v46 = vsel %vm986_vm7, %v1595_v7, %v1597_v45  ;;  %2612 = vmatprep.mubr.msk.f32.mxu1 %vm383_vm0, %v1690_v43  ;;  %v2148_v39 = vpop.permute.xlu1 %2147 }
 0x274   : > { %2603 = vmatprep.subr.mxu0 %v1602_v46  ;;  %2610 = vmatprep.subr.mxu1 %v3229_v10 }
 0x275   : > { %2604 = vmatpush3.msra.mxu0 %v1602_v46  ;;  %2611 = vmatpush3.msra.mxu1 %v3229_v10 }
 0x276   : > { %2615 = vmatprep.subr.mxu0 %v1781_v28  ;;  %2622 = vmatprep.subr.mxu1 %v1873_v35  ;;  %v1779_v49 = vpop.permute.xlu0 %1778 }
 0x277   : > { %2606 = vmatmul.mubr.msk.f32.vlgmr.msra.gmra.mxu0 %vm383_vm0, %v1593_v47  ;;  %2613 = vmatmul.mubr.msk.f32.vlgmr.msra.gmra.mxu1 %vm383_vm0, %v1691_v48 }
 0x278   : > { %2616 = vmatpush3.msra.mxu0 %v1781_v28  ;;  %2623 = vmatpush3.msra.mxu1 %v1873_v35 }
 0x279   : > { %2617 = vmatprep.subr.mxu0 %v1779_v49  ;;  %2619 = vmatprep.mubr.msk.f32.mxu0 %vm383_vm0, %v1776_v50 }
 0x27a   : > { %2618 = vmatpush3.msra.mxu0 %v1779_v49  ;;  %v1871_v54 = vpop.permute.xlu0 %1870  ;;  %2626 = vmatprep.mubr.msk.f32.mxu1 %vm383_vm0, %v1868_v52  ;;  %v2267_v49 = vpop.permute.xlu1 %2266 }
 0x27b   : > { %2629 = vmatprep.subr.mxu0 %v1965_v44  ;;  %2620 = vmatmul.mubr.msk.f32.vlgmr.msra.gmra.mxu0 %vm383_vm0, %v1777_v53 }
 0x27c   : > { %2624 = vmatprep.subr.mxu1 %v1871_v54  ;;  %2630 = vmatpush3.msra.mxu0 %v1965_v44 }
 0x27d   : > { %2625 = vmatpush3.msra.mxu1 %v1871_v54  ;;  %2633 = vmatprep.mubr.msk.f32.mxu0 %vm383_vm0, %v1960_v55 }
 0x27e   : > { %2636 = vmatprep.subr.mxu1 %v2057_v51  ;;  %2627 = vmatmul.mubr.msk.f32.vlgmr.msra.gmra.mxu1 %vm383_vm0, %v1869_v56  ;;  %v1963_v59 = vpop.permute.xlu0 %1962 }
 0x27f   : > { %2637 = vmatpush3.msra.mxu1 %v2057_v51  ;;  %2631 = vmatprep.subr.mxu0 %v1963_v59 }
 0x280   : > { %2632 = vmatpush3.msra.mxu0 %v1963_v59  ;;  %2640 = vmatprep.mubr.msk.f32.mxu1 %vm383_vm0, %v2052_v58 }
 0x281   : > { %2634 = vmatmul.mubr.msk.f32.vlgmr.msra.gmra.mxu0 %vm383_vm0, %v1961_v60  ;;  %2643 = vmatprep.subr.mxu0 %v2176_v62 }
 0x282   : > { %2644 = vmatpush3.msra.mxu0 %v2176_v62  ;;  %v2055_v63 = vpop.permute.xlu0 %2054  ;;  %2647 = vmatprep.mubr.msk.f32.mxu0 %vm383_vm0, %v2161_v61 }
 0x283   : > { %2638 = vmatprep.subr.mxu1 %v2055_v63 }
 0x284   : > { %2639 = vmatpush3.msra.mxu1 %v2055_v63 }
 0x285   : > { %2641 = vmatmul.mubr.msk.f32.vlgmr.msra.gmra.mxu1 %vm383_vm0, %v2053_v0 }
 0x286   : > { %v2170_v2 = vpop.permute.xlu0 %2169 }
 0x287   : > { %v2175_v3 = vsel %vm788_vm5, %v2168_v1, %v2170_v2 }
 0x288   : > { %2645 = vmatprep.subr.mxu0 %v2175_v3 }
 0x289   : > { %2646 = vmatpush3.msra.mxu0 %v2175_v3 }
 0x28a   : > { %2648 = vmatmul.mubr.msk.f32.vlgmr.msra.gmra.mxu0 %vm383_vm0, %v2162_v4 }
 0x293   : > { %v2153_v35 = vpop.permute.xlu0 %2152 }
 0x297   : > { %v2272_v45 = vpop.permute.xlu0 %2271 }
 0x32a   : > { %v2586_v6 = vpop.f32.mrf.mxu1 }
 0x32c   : > { %v1390_v8 = vpop.f32.mrf.mxu1 }
 0x32e   : > { %v2593_v9 = vpop.f32.mrf.mxu0 }
 0x32f   : > { %v1489_v10 = vadd.f32 %v2593_v9, %v2586_v6 }
 0x330   : > { %v1483_v11 = vpop.f32.mrf.mxu0 }
 0x331   : > { %v1484_v14 = vadd.f32 %v1483_v11, %v1390_v8 }
 0x332   : > { %v2600_v15 = vpop.f32.mrf.mxu1 }
 0x333   : > { %v1590_v17 = vadd.f32 %v2600_v15, %v1489_v10 }
 0x334   : > { %v1580_v12 = vpop.f32.mrf.mxu1 }
 0x335   : > { %v1589_v13 = vadd.f32 %v1580_v12, %v1484_v14 }
 0x337   : > { %v2607_v18 = vpop.f32.mrf.mxu0  ;;  %v2614_v19 = vpop.f32.mrf.mxu1 }
 0x338   : > { %v1688_v20 = vadd.f32 %v2607_v18, %v1590_v17 }
 0x339   : > { %v1678_v21 = vpop.f32.mrf.mxu0  ;;  %v1764_v22 = vpop.f32.mrf.mxu1 }
 0x33a   : > { %v1687_v23 = vadd.f32 %v1678_v21, %v1589_v13  ;;  %v1774_v16 = vadd.f32 %v2614_v19, %v1688_v20 }
 0x33b   : > { %v2621_v24 = vpop.f32.mrf.mxu0 }
 0x33c   : > { %v1773_v25 = vadd.f32 %v1764_v22, %v1687_v23  ;;  %v1866_v26 = vadd.f32 %v2621_v24, %v1774_v16 }
 0x33d   : > { %v1856_v5 = vpop.f32.mrf.mxu0 }
 0x33e   : > { %v1865_v7 = vadd.f32 %v1856_v5, %v1773_v25  ;;  %v2628_v27 = vpop.f32.mrf.mxu1 }
 0x33f   : > { %v1958_v28 = vadd.f32 %v2628_v27, %v1866_v26 }
 0x340   : > { %v1948_v29 = vpop.f32.mrf.mxu1 }
 0x341   : > { %v2635_v30 = vpop.f32.mrf.mxu0  ;;  %v1957_v31 = vadd.f32 %v1948_v29, %v1865_v7 }
 0x342   : > { %v2050_v32 = vadd.f32 %v2635_v30, %v1958_v28 }
 0x343   : > { %v2040_v33 = vpop.f32.mrf.mxu0 }
 0x344   : > { %v2049_v36 = vadd.f32 %v2040_v33, %v1957_v31 }
 0x345   : > { %v2642_v34 = vpop.f32.mrf.mxu1 }
 0x346   : > { %v2142_v37 = vadd.f32 %v2642_v34, %v2050_v32 }
 0x347   : > { %v2132_v38 = vpop.f32.mrf.mxu1 }
 0x348   : > { %v2141_v40 = vadd.f32 %v2132_v38, %v2049_v36  ;;  %v2156_v41 = vadd.f32 %v2153_v35, %v2142_v37 }
 0x34a   : > { %v2649_v42 = vpop.f32.mrf.mxu0  ;;  %v2155_v43 = vadd.f32 %v2148_v39, %v2141_v40 }
 0x34b   : > { %v2261_v44 = vadd.f32 %v2649_v42, %v2156_v41 }
 0x34c   : > { %v2251_v46 = vpop.f32.mrf.mxu0 }
 0x34d   : > { %v2275_v47 = vadd.f32 %v2272_v45, %v2261_v44  ;;  %v2260_v48 = vadd.f32 %v2251_v46, %v2155_v43 }
 0x34f   : > { %v2277_v50 = vmax.f32 %v2275_v47, 0.0  ;;  %v2274_v51 = vadd.f32 %v2267_v49, %v2260_v48 }
 0x351   : > { %2279 = vst.msk [vmem:[%s352_s4 + $0x8] sm:$0xff] %vm1286_vm9, %v2277_v50  ;;  %v2276_v52 = vmax.f32 %v2274_v51, 0.0 }
 0x353   : > { %2278 = vst.msk [vmem:[%s352_s4] sm:$0xff] %vm1286_vm9, %v2276_v52 }
 0x354   : > { %2836 = shalt.err (!%p2833_p9)
}
 0x355   : > { %s2837_s22 = scalar_lea.hbm %s3305_s11, 256  ;;  %s2841_s25 = scalar_lea.hbm %s3360_s8, 512 }
 0x356   : > { %p2838_p13 = scmp.ne.s32.totalorder %s3305_s11, %s2837_s22  ;;  %p2842_p4 = scmp.lt.s32.totalorder %s3305_s11, %s3360_s8 }
 0x357   : > { %p2843_p8 = scmp.lt.s32.totalorder %s2841_s25, %s2837_s22 }
 0x358   : > { %p2839_p5 = pnand %p2838_p13, %p3380_p10 }
 0x359   : > { %p2844_p3 = por %p2843_p8, %p2842_p4 }
 0x35a   : > { %p2840_p0 = pneg %p2839_p5 }
 0x35c   : > { %p2845_p11 = pnand %p2844_p3, %p2840_p0 }
 0x35e   : > { %2848 = shalt.err (!%p2845_p11)
}
 0x35f   : > { %s2916_s18 = smov 128   ;;  %s2917_s19 = smov 8  }
 0x360   : > { %2663 = dma.vmem_to_hbm [thread:$0]  (%p3380_p10), %s3307_s15, 256, %s3305_s11, %s2281_s9, %s2916_s18, %s2916_s18, %s2917_s19  }
 0x361 PF: > { %s2309_s20 = sand.u32 1, %s2879_s27   ;;  %p3381_p1 = scmp.ne.s32.totalorder %s3368_s12, 0 }
 0x362   : > { %p3382_p2 = scmp.ge.s32.totalorder %s2891_s30, 2  ;;  %s2310_s23 = scalar_lea.sflag [#allocation5], %s2309_s20 }
 0x364   : > { %p2677_p6 = pnand %p3382_p2, %p3381_p1 }
 0x366   : > { %p2678_p12 = pneg %p2677_p6 }
 0x368   : > { %2874 = dma.done.wait (%p2678_p12), %s2310_s23, 256  }
 0x369   : > { %2876 = vsyncadd (%p2678_p12), %s2310_s23, 4294967040  ;;  %p22_p7 = scmp.ge.s32.totalorder %s3035_s10, 4   ;;  %s3383_s27 = smov %s2883_s28 }
 0x36a   : > { %s3384_s28 = smov %s2887_s29  ;;  %s3385_s29 = smov %s3051_s17 }
 0x36b   : > { %s3386_s30 = smov %s3035_s10  ;;  %24 = sbr.rel (!%p22_p7) target bundleno = 9 (0x9), region = 121 }
 0x370   :  { %2315 = vsyncpa [#allocation4], 1 }
 0x371   :  { %2317 = vsyncpa [#allocation4 + $0x1], 1 }
 0x372   :  { %2318 = vsyncpa [#allocation7], 1 }
 0x373   :  { %2319 = vsyncpa [#allocation5], 1 }
 0x374   :  { %2321 = vsyncpa [#allocation5 + $0x1], 1 }

</bundles_post_ra>
